<compile_context>
chip_gen: v7x
topology: tpu7x:2x2x1
jax: 0.10.0
libtpu: 0.0.40
codegen_flags: <defaults>
</compile_context>

<pallas_src>
import functools

import jax
import jax.numpy as jnp
from jax.experimental import pallas as pl
from jax.experimental.pallas import tpu as pltpu


def _round_up(n, m):
    return -(-n // m) * m


# conv2 tap bookkeeping: for a 3x3 / stride-2 / pad-1 conv applied to the
# stride-2 phase decomposition of its input, tap offset d in (-1, 0, +1)
# (di = 0, 1, 2) reads phase _PH[di] at row offset _OFF[di] of the phase
# buffer that carries one leading row/col of zeros.
_PH = (1, 0, 1)
_OFF = (0, 1, 1)


# ------------------------------ fused kernel --------------------------------

def _fused_forward_kernel(xcol_ref, w1_ref, b1_ref, w2_ref, b2_ref,
                          wf_ref, bf_ref, w3_ref, b3_ref,
                          w4_ref, b4_ref, w5_ref, b5_ref, o_ref,
                          *, hh, wh):
    """Whole forward for one image (the grid is over batch only).

    xcol_ref : (4*hh*wh, K1P) bf16  conv1 im2col, rows phase-ordered (a,b,i,j)
    w1_ref   : (K1P, C1)      bf16  conv1 weights (Normalize 1/std folded in)
    w2_ref   : (9, C1, C2)    bf16  conv2 weights, tap-major
    wf/w3/w4/w5 : feature + decoder MLP weights (bf16);  b* : biases (f32)
    o_ref    : (1, n_points*3) f32
    """
    c1 = w1_ref.shape[1]
    c2 = w2_ref.shape[2]

    # ---- conv1: one K=K1P MXU dot (im2col built glue-side), bias + ReLU.
    y1 = jnp.dot(xcol_ref[...], w1_ref[...],
                 preferred_element_type=jnp.float32)
    y1 = jnp.maximum(y1 + b1_ref[...], 0.0)                # (4*hh*wh, c1) f32

    # Rows are already ordered by stride-2 output phase (a, b, i, j), so the
    # four phases conv2 needs are contiguous; add one leading zero row/col per
    # phase so every conv2 tap below is a static contiguous slice.  y1 never
    # leaves VMEM/registers (no HBM round trip, no glue-side shuffle).
    y1 = y1.reshape(2, 2, hh, wh, c1)
    zrow = jnp.zeros((2, 2, 1, wh, c1), jnp.float32)
    y1p = jnp.concatenate([zrow, y1], axis=2)              # (2,2,hh+1,wh,c1)
    zcol = jnp.zeros((2, 2, hh + 1, 1, c1), jnp.float32)
    y1p = jnp.concatenate([zcol, y1p], axis=3)             # (2,2,hh+1,wh+1,c1)

    # ---- conv2 (3x3 / stride-2 / pad-1) + bias + ReLU, f32 accumulate.
    acc = jnp.zeros((hh * wh, c2), jnp.float32)
    for di in range(3):
        for dj in range(3):
            tap = y1p[_PH[di], _PH[dj],
                      _OFF[di]:_OFF[di] + hh,
                      _OFF[dj]:_OFF[dj] + wh, :]
            tap = tap.reshape(hh * wh, c1).astype(jnp.bfloat16)
            acc = acc + jnp.dot(tap, w2_ref[di * 3 + dj],
                                preferred_element_type=jnp.float32)
    y2 = jnp.maximum(acc + b2_ref[...], 0.0)               # (hh*wh, c2) f32

    # ---- global average pool: cheap XLU reduction, result stays resident.
    pooled = (jnp.sum(y2, axis=0, keepdims=True)
              * (1.0 / (hh * wh))).astype(jnp.bfloat16)    # (1, c2)

    # ---- encoder feature linear + decoderPointCloud MLP (ReLU, ReLU, tanh).
    f = (jnp.dot(pooled, wf_ref[...], preferred_element_type=jnp.float32)
         + bf_ref[...])
    h = jnp.maximum(
        jnp.dot(f.astype(jnp.bfloat16), w3_ref[...],
                preferred_element_type=jnp.float32) + b3_ref[...], 0.0)
    h = jnp.maximum(
        jnp.dot(h.astype(jnp.bfloat16), w4_ref[...],
                preferred_element_type=jnp.float32) + b4_ref[...], 0.0)
    pts = jnp.tanh(
        jnp.dot(h.astype(jnp.bfloat16), w5_ref[...],
                preferred_element_type=jnp.float32) + b5_ref[...])
    o_ref[...] = pts.astype(o_ref.dtype)


# ------------------------------ call wrapper ---------------------------------

def fused_forward(x_col, weights, *, hh, wh, n3):
    """Single pallas_call for the whole forward, gridded only over batch.

    Weight blocks use constant index_maps, so they are DMA'd once and stay
    resident in VMEM across batch iterations (total < 0.3 MB in bf16)."""
    B, s1, k1p = x_col.shape

    def whole(a):
        nd = a.ndim
        return pl.BlockSpec(a.shape, lambda bi, _nd=nd: (0,) * _nd)

    kernel = functools.partial(_fused_forward_kernel, hh=hh, wh=wh)
    return pl.pallas_call(
        kernel,
        out_shape=jax.ShapeDtypeStruct((B, 1, n3), jnp.float32),
        grid=(B,),
        in_specs=([pl.BlockSpec((None, s1, k1p), lambda bi: (bi, 0, 0))]
                  + [whole(a) for a in weights]),
        out_specs=pl.BlockSpec((None, 1, n3), lambda bi: (bi, 0, 0)),
        compiler_params=pltpu.CompilerParams(
            dimension_semantics=("parallel",)),
    )(x_col, *weights)


# ------------------------------ JAX glue -------------------------------------

def conv1_im2col_phased(images_nchw, mean):
    """transforms.Normalize (mean term) + im2col for the 3x3/s2/p1 conv1.

    Rows are ordered by the stride-2 output phase (a, b, i, j) so the fused
    kernel can slice conv2's taps with static offsets.  Exactness of the
    Normalize fold: the image is centered BEFORE zero padding, so padded taps
    contribute 0, exactly as if the normalized image were zero padded; the
    per-channel 1/std is folded into the conv1 weights.  Pure layout plumbing
    on ~27 KB / image; fuses into XLA dispatch."""
    x = jnp.transpose(images_nchw, (0, 2, 3, 1)).astype(jnp.float32)  # NHWC
    B, H, W, C = x.shape
    ho, wo = H // 2, W // 2
    xp = jnp.pad(x - mean, ((0, 0), (1, 1), (1, 1), (0, 0)))
    taps = [xp[:, di:di + 2 * ho:2, dj:dj + 2 * wo:2, :]
            for di in range(3) for dj in range(3)]
    p = jnp.stack(taps, axis=3).reshape(B, ho, wo, 9 * C)   # col = t*C + c
    p = p.reshape(B, ho // 2, 2, wo // 2, 2, 9 * C)
    p = jnp.transpose(p, (0, 2, 4, 1, 3, 5)).reshape(B, ho * wo, 9 * C)
    k1p = _round_up(9 * C, 32)
    p = jnp.pad(p, ((0, 0), (0, 0), (0, k1p - 9 * C)))
    return p.astype(jnp.bfloat16), ho, wo


# --------------------------- Model (point branch) ----------------------------

class SingleViewTo3DPoint:
    """Equivalent of SingleViewto3D(args) with args.type == 'point'."""

    def __init__(self, key, n_points=128, in_ch=3, c1=32, c2=128,
                 feat_dim=128, hidden=128):
        self.n_points = n_points
        n3 = n_points * 3
        self.mean = jnp.array([0.485, 0.456, 0.406], jnp.float32)
        inv_std = 1.0 / jnp.array([0.229, 0.224, 0.225], jnp.float32)

        def he(k, shape, fan_in):
            return (jax.random.normal(k, shape, jnp.float32)
                    * (2.0 / fan_in) ** 0.5)

        ks = jax.random.split(key, 6)

        # conv1: weight rows (tap t = di*3+dj, in-channel c) -> t*in_ch + c,
        # contraction padded 27 -> 32; Normalize's 1/std folded per channel.
        k1, k1p = 9 * in_ch, _round_up(9 * in_ch, 32)
        w1 = he(ks[0], (9, in_ch, c1), 9 * in_ch) * inv_std[None, :, None]
        w1 = jnp.pad(w1.reshape(k1, c1), ((0, k1p - k1), (0, 0)))
        self.w_conv1 = w1.astype(jnp.bfloat16)
        self.b_conv1 = jnp.zeros((1, c1), jnp.float32)

        # conv2: tap-major (9, C1, C2); contraction kept at the logical C1
        # width (no zero-channel padding -> no wasted MXU work / y1 bytes).
        self.w_conv2 = he(ks[1], (9, c1, c2), 9 * c1).astype(jnp.bfloat16)
        self.b_conv2 = jnp.zeros((1, c2), jnp.float32)

        # encoder feature linear + decoderPointCloud MLP (-> tanh points).
        self.w_feat = he(ks[2], (c2, feat_dim), c2).astype(jnp.bfloat16)
        self.b_feat = jnp.zeros((1, feat_dim), jnp.float32)
        self.w_fc1 = he(ks[3], (feat_dim, hidden), feat_dim).astype(jnp.bfloat16)
        self.b_fc1 = jnp.zeros((1, hidden), jnp.float32)
        self.w_fc2 = he(ks[4], (hidden, hidden), hidden).astype(jnp.bfloat16)
        self.b_fc2 = jnp.zeros((1, hidden), jnp.float32)
        self.w_fc3 = he(ks[5], (hidden, n3), hidden).astype(jnp.bfloat16)
        self.b_fc3 = jnp.zeros((1, n3), jnp.float32)

    def forward(self, images_nchw):
        # images_nchw: (B, 3, H, W) float32 in [0, 1]  (PyTorch layout)
        B = images_nchw.shape[0]
        x_col, ho1, wo1 = conv1_im2col_phased(images_nchw, self.mean)
        weights = (self.w_conv1, self.b_conv1, self.w_conv2, self.b_conv2,
                   self.w_feat, self.b_feat, self.w_fc1, self.b_fc1,
                   self.w_fc2, self.b_fc2, self.w_fc3, self.b_fc3)
        out = fused_forward(x_col, weights, hh=ho1 // 2, wh=wo1 // 2,
                            n3=self.n_points * 3)
        return out.reshape(B, self.n_points, 3)


# ---------------------------------- main -------------------------------------

if __name__ == "__main__":
    key = jax.random.PRNGKey(0)
    k_img, k_params = jax.random.split(key)

    # small deterministic inputs: batch=2, RGB 32x32 images (NCHW like PyTorch)
    images = jax.random.uniform(k_img, (2, 3, 32, 32), dtype=jnp.float32)

    model = SingleViewTo3DPoint(k_params, n_points=128)
    fwd = jax.jit(model.forward)
    out = jax.block_until_ready(fwd(images))

    assert out.shape == (2, 128, 3), out.shape
    assert bool(jnp.all(jnp.isfinite(out)))
    assert bool(jnp.all(jnp.abs(out) <= 1.0 + 1e-3))   # tanh output range
    print("KERNEL_OK")
</pallas_src>

<mosaic_0001>
module attributes {stable_mosaic.version = 11 : i64} {
  func.func @_fused_forward_kernel(%arg0: i32, %arg1: memref<1x256x32xbf16, #tpu.memory_space<vmem>>, %arg2: memref<32x32xbf16, #tpu.memory_space<vmem>>, %arg3: memref<1x32xf32, #tpu.memory_space<vmem>>, %arg4: memref<9x32x128xbf16, #tpu.memory_space<vmem>>, %arg5: memref<1x128xf32, #tpu.memory_space<vmem>>, %arg6: memref<128x128xbf16, #tpu.memory_space<vmem>>, %arg7: memref<1x128xf32, #tpu.memory_space<vmem>>, %arg8: memref<128x128xbf16, #tpu.memory_space<vmem>>, %arg9: memref<1x128xf32, #tpu.memory_space<vmem>>, %arg10: memref<128x128xbf16, #tpu.memory_space<vmem>>, %arg11: memref<1x128xf32, #tpu.memory_space<vmem>>, %arg12: memref<128x384xbf16, #tpu.memory_space<vmem>>, %arg13: memref<1x384xf32, #tpu.memory_space<vmem>>, %arg14: memref<1x1x384xf32, #tpu.memory_space<vmem>>) attributes {dimension_semantics = [#tpu.dimension_semantics<parallel>], iteration_bounds = array<i64: 2>, scalar_prefetch = 0 : i64, scratch_operands = 0 : i64, tpu.core_type = #tpu.core_type<tc>, window_params = [{transform_indices = @transform_0, window_bounds = array<i64: 1, 256, 32>}, {pipeline_mode = #tpu.pipeline_mode<synchronous>, transform_indices = @transform_1, window_bounds = array<i64: 32, 32>}, {pipeline_mode = #tpu.pipeline_mode<synchronous>, transform_indices = @transform_2, window_bounds = array<i64: 1, 32>}, {pipeline_mode = #tpu.pipeline_mode<synchronous>, transform_indices = @transform_3, window_bounds = array<i64: 9, 32, 128>}, {pipeline_mode = #tpu.pipeline_mode<synchronous>, transform_indices = @transform_4, window_bounds = array<i64: 1, 128>}, {pipeline_mode = #tpu.pipeline_mode<synchronous>, transform_indices = @transform_5, window_bounds = array<i64: 128, 128>}, {pipeline_mode = #tpu.pipeline_mode<synchronous>, transform_indices = @transform_6, window_bounds = array<i64: 1, 128>}, {pipeline_mode = #tpu.pipeline_mode<synchronous>, transform_indices = @transform_7, window_bounds = array<i64: 128, 128>}, {pipeline_mode = #tpu.pipeline_mode<synchronous>, transform_indices = @transform_8, window_bounds = array<i64: 1, 128>}, {pipeline_mode = #tpu.pipeline_mode<synchronous>, transform_indices = @transform_9, window_bounds = array<i64: 128, 128>}, {pipeline_mode = #tpu.pipeline_mode<synchronous>, transform_indices = @transform_10, window_bounds = array<i64: 1, 128>}, {pipeline_mode = #tpu.pipeline_mode<synchronous>, transform_indices = @transform_11, window_bounds = array<i64: 128, 384>}, {pipeline_mode = #tpu.pipeline_mode<synchronous>, transform_indices = @transform_12, window_bounds = array<i64: 1, 384>}, {transform_indices = @transform_13, window_bounds = array<i64: 1, 1, 384>}]} {
    %c0 = arith.constant 0 : index
    %c0_0 = arith.constant 0 : index
    %c0_1 = arith.constant 0 : index
    %0 = vector.load %arg1[%c0, %c0_0, %c0_1] : memref<1x256x32xbf16, #tpu.memory_space<vmem>>, vector<1x256x32xbf16>
    %1 = vector.shape_cast %0 : vector<1x256x32xbf16> to vector<256x32xbf16>
    %c0_2 = arith.constant 0 : index
    %c0_3 = arith.constant 0 : index
    %2 = vector.load %arg2[%c0_2, %c0_3] : memref<32x32xbf16, #tpu.memory_space<vmem>>, vector<32x32xbf16>
    %cst = arith.constant dense<0.000000e+00> : vector<256x32xf32>
    %3 = tpu.matmul %1, %2, %cst {dimension_numbers = #tpu.dot_dimension_numbers<[1], [0], [0], [1], [0, 0, 1, 1], [], []>} : vector<256x32xbf16>, vector<32x32xbf16>, vector<256x32xf32> -> vector<256x32xf32>
    %c0_4 = arith.constant 0 : index
    %c0_5 = arith.constant 0 : index
    %4 = vector.load %arg3[%c0_4, %c0_5] : memref<1x32xf32, #tpu.memory_space<vmem>>, vector<1x32xf32>
    %5 = vector.broadcast %4 : vector<1x32xf32> to vector<256x32xf32>
    %6 = arith.addf %3, %5 : vector<256x32xf32>
    %cst_6 = arith.constant 0.000000e+00 : f32
    %7 = vector.broadcast %cst_6 : f32 to vector<256x32xf32>
    %8 = arith.maximumf %6, %7 : vector<256x32xf32>
    %9 = vector.shape_cast %8 : vector<256x32xf32> to vector<2x2x8x8x32xf32>
    %cst_7 = arith.constant 0.000000e+00 : f32
    %10 = vector.broadcast %cst_7 : f32 to vector<2x2x1x8x32xf32>
    %11 = tpu.concatenate %10, %9 in 2 : vector<2x2x1x8x32xf32>, vector<2x2x8x8x32xf32> -> vector<2x2x9x8x32xf32>
    %cst_8 = arith.constant 0.000000e+00 : f32
    %12 = vector.broadcast %cst_8 : f32 to vector<2x2x9x1x32xf32>
    %13 = tpu.concatenate %12, %11 in 3 : vector<2x2x9x1x32xf32>, vector<2x2x9x8x32xf32> -> vector<2x2x9x9x32xf32>
    %cst_9 = arith.constant 0.000000e+00 : f32
    %14 = vector.broadcast %cst_9 : f32 to vector<64x128xf32>
    %15 = vector.extract_strided_slice %13 {offsets = [1, 1, 0, 0, 0], sizes = [1, 1, 8, 8, 32], strides = [1, 1, 1, 1, 1]} : vector<2x2x9x9x32xf32> to vector<1x1x8x8x32xf32>
    %16 = vector.shape_cast %15 : vector<1x1x8x8x32xf32> to vector<8x8x32xf32>
    %17 = vector.shape_cast %16 : vector<8x8x32xf32> to vector<64x32xf32>
    %18 = arith.truncf %17 : vector<64x32xf32> to vector<64x32xbf16>
    %c0_10 = arith.constant 0 : index
    %c0_11 = arith.constant 0 : index
    %c0_12 = arith.constant 0 : index
    %19 = vector.load %arg4[%c0_10, %c0_11, %c0_12] : memref<9x32x128xbf16, #tpu.memory_space<vmem>>, vector<1x32x128xbf16>
    %20 = vector.shape_cast %19 : vector<1x32x128xbf16> to vector<32x128xbf16>
    %cst_13 = arith.constant dense<0.000000e+00> : vector<64x128xf32>
    %21 = tpu.matmul %18, %20, %cst_13 {dimension_numbers = #tpu.dot_dimension_numbers<[1], [0], [0], [1], [0, 0, 1, 1], [], []>} : vector<64x32xbf16>, vector<32x128xbf16>, vector<64x128xf32> -> vector<64x128xf32>
    %22 = arith.addf %14, %21 : vector<64x128xf32>
    %23 = vector.extract_strided_slice %13 {offsets = [1, 0, 0, 1, 0], sizes = [1, 1, 8, 8, 32], strides = [1, 1, 1, 1, 1]} : vector<2x2x9x9x32xf32> to vector<1x1x8x8x32xf32>
    %24 = vector.shape_cast %23 : vector<1x1x8x8x32xf32> to vector<8x8x32xf32>
    %25 = vector.shape_cast %24 : vector<8x8x32xf32> to vector<64x32xf32>
    %26 = arith.truncf %25 : vector<64x32xf32> to vector<64x32xbf16>
    %c1 = arith.constant 1 : index
    %c0_14 = arith.constant 0 : index
    %c0_15 = arith.constant 0 : index
    %27 = vector.load %arg4[%c1, %c0_14, %c0_15] : memref<9x32x128xbf16, #tpu.memory_space<vmem>>, vector<1x32x128xbf16>
    %28 = vector.shape_cast %27 : vector<1x32x128xbf16> to vector<32x128xbf16>
    %cst_16 = arith.constant dense<0.000000e+00> : vector<64x128xf32>
    %29 = tpu.matmul %26, %28, %cst_16 {dimension_numbers = #tpu.dot_dimension_numbers<[1], [0], [0], [1], [0, 0, 1, 1], [], []>} : vector<64x32xbf16>, vector<32x128xbf16>, vector<64x128xf32> -> vector<64x128xf32>
    %30 = arith.addf %22, %29 : vector<64x128xf32>
    %31 = vector.extract_strided_slice %13 {offsets = [1, 1, 0, 1, 0], sizes = [1, 1, 8, 8, 32], strides = [1, 1, 1, 1, 1]} : vector<2x2x9x9x32xf32> to vector<1x1x8x8x32xf32>
    %32 = vector.shape_cast %31 : vector<1x1x8x8x32xf32> to vector<8x8x32xf32>
    %33 = vector.shape_cast %32 : vector<8x8x32xf32> to vector<64x32xf32>
    %34 = arith.truncf %33 : vector<64x32xf32> to vector<64x32xbf16>
    %c2 = arith.constant 2 : index
    %c0_17 = arith.constant 0 : index
    %c0_18 = arith.constant 0 : index
    %35 = vector.load %arg4[%c2, %c0_17, %c0_18] : memref<9x32x128xbf16, #tpu.memory_space<vmem>>, vector<1x32x128xbf16>
    %36 = vector.shape_cast %35 : vector<1x32x128xbf16> to vector<32x128xbf16>
    %cst_19 = arith.constant dense<0.000000e+00> : vector<64x128xf32>
    %37 = tpu.matmul %34, %36, %cst_19 {dimension_numbers = #tpu.dot_dimension_numbers<[1], [0], [0], [1], [0, 0, 1, 1], [], []>} : vector<64x32xbf16>, vector<32x128xbf16>, vector<64x128xf32> -> vector<64x128xf32>
    %38 = arith.addf %30, %37 : vector<64x128xf32>
    %39 = vector.extract_strided_slice %13 {offsets = [0, 1, 1, 0, 0], sizes = [1, 1, 8, 8, 32], strides = [1, 1, 1, 1, 1]} : vector<2x2x9x9x32xf32> to vector<1x1x8x8x32xf32>
    %40 = vector.shape_cast %39 : vector<1x1x8x8x32xf32> to vector<8x8x32xf32>
    %41 = vector.shape_cast %40 : vector<8x8x32xf32> to vector<64x32xf32>
    %42 = arith.truncf %41 : vector<64x32xf32> to vector<64x32xbf16>
    %c3 = arith.constant 3 : index
    %c0_20 = arith.constant 0 : index
    %c0_21 = arith.constant 0 : index
    %43 = vector.load %arg4[%c3, %c0_20, %c0_21] : memref<9x32x128xbf16, #tpu.memory_space<vmem>>, vector<1x32x128xbf16>
    %44 = vector.shape_cast %43 : vector<1x32x128xbf16> to vector<32x128xbf16>
    %cst_22 = arith.constant dense<0.000000e+00> : vector<64x128xf32>
    %45 = tpu.matmul %42, %44, %cst_22 {dimension_numbers = #tpu.dot_dimension_numbers<[1], [0], [0], [1], [0, 0, 1, 1], [], []>} : vector<64x32xbf16>, vector<32x128xbf16>, vector<64x128xf32> -> vector<64x128xf32>
    %46 = arith.addf %38, %45 : vector<64x128xf32>
    %47 = vector.extract_strided_slice %13 {offsets = [0, 0, 1, 1, 0], sizes = [1, 1, 8, 8, 32], strides = [1, 1, 1, 1, 1]} : vector<2x2x9x9x32xf32> to vector<1x1x8x8x32xf32>
    %48 = vector.shape_cast %47 : vector<1x1x8x8x32xf32> to vector<8x8x32xf32>
    %49 = vector.shape_cast %48 : vector<8x8x32xf32> to vector<64x32xf32>
    %50 = arith.truncf %49 : vector<64x32xf32> to vector<64x32xbf16>
    %c4 = arith.constant 4 : index
    %c0_23 = arith.constant 0 : index
    %c0_24 = arith.constant 0 : index
    %51 = vector.load %arg4[%c4, %c0_23, %c0_24] : memref<9x32x128xbf16, #tpu.memory_space<vmem>>, vector<1x32x128xbf16>
    %52 = vector.shape_cast %51 : vector<1x32x128xbf16> to vector<32x128xbf16>
    %cst_25 = arith.constant dense<0.000000e+00> : vector<64x128xf32>
    %53 = tpu.matmul %50, %52, %cst_25 {dimension_numbers = #tpu.dot_dimension_numbers<[1], [0], [0], [1], [0, 0, 1, 1], [], []>} : vector<64x32xbf16>, vector<32x128xbf16>, vector<64x128xf32> -> vector<64x128xf32>
    %54 = arith.addf %46, %53 : vector<64x128xf32>
    %55 = vector.extract_strided_slice %13 {offsets = [0, 1, 1, 1, 0], sizes = [1, 1, 8, 8, 32], strides = [1, 1, 1, 1, 1]} : vector<2x2x9x9x32xf32> to vector<1x1x8x8x32xf32>
    %56 = vector.shape_cast %55 : vector<1x1x8x8x32xf32> to vector<8x8x32xf32>
    %57 = vector.shape_cast %56 : vector<8x8x32xf32> to vector<64x32xf32>
    %58 = arith.truncf %57 : vector<64x32xf32> to vector<64x32xbf16>
    %c5 = arith.constant 5 : index
    %c0_26 = arith.constant 0 : index
    %c0_27 = arith.constant 0 : index
    %59 = vector.load %arg4[%c5, %c0_26, %c0_27] : memref<9x32x128xbf16, #tpu.memory_space<vmem>>, vector<1x32x128xbf16>
    %60 = vector.shape_cast %59 : vector<1x32x128xbf16> to vector<32x128xbf16>
    %cst_28 = arith.constant dense<0.000000e+00> : vector<64x128xf32>
    %61 = tpu.matmul %58, %60, %cst_28 {dimension_numbers = #tpu.dot_dimension_numbers<[1], [0], [0], [1], [0, 0, 1, 1], [], []>} : vector<64x32xbf16>, vector<32x128xbf16>, vector<64x128xf32> -> vector<64x128xf32>
    %62 = arith.addf %54, %61 : vector<64x128xf32>
    %63 = vector.extract_strided_slice %13 {offsets = [1, 1, 1, 0, 0], sizes = [1, 1, 8, 8, 32], strides = [1, 1, 1, 1, 1]} : vector<2x2x9x9x32xf32> to vector<1x1x8x8x32xf32>
    %64 = vector.shape_cast %63 : vector<1x1x8x8x32xf32> to vector<8x8x32xf32>
    %65 = vector.shape_cast %64 : vector<8x8x32xf32> to vector<64x32xf32>
    %66 = arith.truncf %65 : vector<64x32xf32> to vector<64x32xbf16>
    %c6 = arith.constant 6 : index
    %c0_29 = arith.constant 0 : index
    %c0_30 = arith.constant 0 : index
    %67 = vector.load %arg4[%c6, %c0_29, %c0_30] : memref<9x32x128xbf16, #tpu.memory_space<vmem>>, vector<1x32x128xbf16>
    %68 = vector.shape_cast %67 : vector<1x32x128xbf16> to vector<32x128xbf16>
    %cst_31 = arith.constant dense<0.000000e+00> : vector<64x128xf32>
    %69 = tpu.matmul %66, %68, %cst_31 {dimension_numbers = #tpu.dot_dimension_numbers<[1], [0], [0], [1], [0, 0, 1, 1], [], []>} : vector<64x32xbf16>, vector<32x128xbf16>, vector<64x128xf32> -> vector<64x128xf32>
    %70 = arith.addf %62, %69 : vector<64x128xf32>
    %71 = vector.extract_strided_slice %13 {offsets = [1, 0, 1, 1, 0], sizes = [1, 1, 8, 8, 32], strides = [1, 1, 1, 1, 1]} : vector<2x2x9x9x32xf32> to vector<1x1x8x8x32xf32>
    %72 = vector.shape_cast %71 : vector<1x1x8x8x32xf32> to vector<8x8x32xf32>
    %73 = vector.shape_cast %72 : vector<8x8x32xf32> to vector<64x32xf32>
    %74 = arith.truncf %73 : vector<64x32xf32> to vector<64x32xbf16>
    %c7 = arith.constant 7 : index
    %c0_32 = arith.constant 0 : index
    %c0_33 = arith.constant 0 : index
    %75 = vector.load %arg4[%c7, %c0_32, %c0_33] : memref<9x32x128xbf16, #tpu.memory_space<vmem>>, vector<1x32x128xbf16>
    %76 = vector.shape_cast %75 : vector<1x32x128xbf16> to vector<32x128xbf16>
    %cst_34 = arith.constant dense<0.000000e+00> : vector<64x128xf32>
    %77 = tpu.matmul %74, %76, %cst_34 {dimension_numbers = #tpu.dot_dimension_numbers<[1], [0], [0], [1], [0, 0, 1, 1], [], []>} : vector<64x32xbf16>, vector<32x128xbf16>, vector<64x128xf32> -> vector<64x128xf32>
    %78 = arith.addf %70, %77 : vector<64x128xf32>
    %79 = vector.extract_strided_slice %13 {offsets = [1, 1, 1, 1, 0], sizes = [1, 1, 8, 8, 32], strides = [1, 1, 1, 1, 1]} : vector<2x2x9x9x32xf32> to vector<1x1x8x8x32xf32>
    %80 = vector.shape_cast %79 : vector<1x1x8x8x32xf32> to vector<8x8x32xf32>
    %81 = vector.shape_cast %80 : vector<8x8x32xf32> to vector<64x32xf32>
    %82 = arith.truncf %81 : vector<64x32xf32> to vector<64x32xbf16>
    %c8 = arith.constant 8 : index
    %c0_35 = arith.constant 0 : index
    %c0_36 = arith.constant 0 : index
    %83 = vector.load %arg4[%c8, %c0_35, %c0_36] : memref<9x32x128xbf16, #tpu.memory_space<vmem>>, vector<1x32x128xbf16>
    %84 = vector.shape_cast %83 : vector<1x32x128xbf16> to vector<32x128xbf16>
    %cst_37 = arith.constant dense<0.000000e+00> : vector<64x128xf32>
    %85 = tpu.matmul %82, %84, %cst_37 {dimension_numbers = #tpu.dot_dimension_numbers<[1], [0], [0], [1], [0, 0, 1, 1], [], []>} : vector<64x32xbf16>, vector<32x128xbf16>, vector<64x128xf32> -> vector<64x128xf32>
    %86 = arith.addf %78, %85 : vector<64x128xf32>
    %c0_38 = arith.constant 0 : index
    %c0_39 = arith.constant 0 : index
    %87 = vector.load %arg5[%c0_38, %c0_39] : memref<1x128xf32, #tpu.memory_space<vmem>>, vector<1x128xf32>
    %88 = vector.broadcast %87 : vector<1x128xf32> to vector<64x128xf32>
    %89 = arith.addf %86, %88 : vector<64x128xf32>
    %cst_40 = arith.constant 0.000000e+00 : f32
    %90 = vector.broadcast %cst_40 : f32 to vector<64x128xf32>
    %91 = arith.maximumf %89, %90 : vector<64x128xf32>
    %cst_41 = arith.constant dense<0.000000e+00> : vector<128xf32>
    %92 = vector.multi_reduction <add>, %91, %cst_41 [0] : vector<64x128xf32> to vector<128xf32>
    %93 = vector.shape_cast %92 : vector<128xf32> to vector<1x128xf32>
    %cst_42 = arith.constant 1.562500e-02 : f32
    %94 = vector.broadcast %cst_42 : f32 to vector<1x128xf32>
    %95 = arith.mulf %93, %94 : vector<1x128xf32>
    %96 = arith.truncf %95 : vector<1x128xf32> to vector<1x128xbf16>
    %c0_43 = arith.constant 0 : index
    %c0_44 = arith.constant 0 : index
    %97 = vector.load %arg6[%c0_43, %c0_44] : memref<128x128xbf16, #tpu.memory_space<vmem>>, vector<128x128xbf16>
    %cst_45 = arith.constant dense<0.000000e+00> : vector<1x128xf32>
    %98 = tpu.matmul %96, %97, %cst_45 {dimension_numbers = #tpu.dot_dimension_numbers<[1], [0], [0], [1], [0, 0, 1, 1], [], []>} : vector<1x128xbf16>, vector<128x128xbf16>, vector<1x128xf32> -> vector<1x128xf32>
    %c0_46 = arith.constant 0 : index
    %c0_47 = arith.constant 0 : index
    %99 = vector.load %arg7[%c0_46, %c0_47] : memref<1x128xf32, #tpu.memory_space<vmem>>, vector<1x128xf32>
    %100 = arith.addf %98, %99 : vector<1x128xf32>
    %101 = arith.truncf %100 : vector<1x128xf32> to vector<1x128xbf16>
    %c0_48 = arith.constant 0 : index
    %c0_49 = arith.constant 0 : index
    %102 = vector.load %arg8[%c0_48, %c0_49] : memref<128x128xbf16, #tpu.memory_space<vmem>>, vector<128x128xbf16>
    %cst_50 = arith.constant dense<0.000000e+00> : vector<1x128xf32>
    %103 = tpu.matmul %101, %102, %cst_50 {dimension_numbers = #tpu.dot_dimension_numbers<[1], [0], [0], [1], [0, 0, 1, 1], [], []>} : vector<1x128xbf16>, vector<128x128xbf16>, vector<1x128xf32> -> vector<1x128xf32>
    %c0_51 = arith.constant 0 : index
    %c0_52 = arith.constant 0 : index
    %104 = vector.load %arg9[%c0_51, %c0_52] : memref<1x128xf32, #tpu.memory_space<vmem>>, vector<1x128xf32>
    %105 = arith.addf %103, %104 : vector<1x128xf32>
    %cst_53 = arith.constant 0.000000e+00 : f32
    %106 = vector.broadcast %cst_53 : f32 to vector<1x128xf32>
    %107 = arith.maximumf %105, %106 : vector<1x128xf32>
    %108 = arith.truncf %107 : vector<1x128xf32> to vector<1x128xbf16>
    %c0_54 = arith.constant 0 : index
    %c0_55 = arith.constant 0 : index
    %109 = vector.load %arg10[%c0_54, %c0_55] : memref<128x128xbf16, #tpu.memory_space<vmem>>, vector<128x128xbf16>
    %cst_56 = arith.constant dense<0.000000e+00> : vector<1x128xf32>
    %110 = tpu.matmul %108, %109, %cst_56 {dimension_numbers = #tpu.dot_dimension_numbers<[1], [0], [0], [1], [0, 0, 1, 1], [], []>} : vector<1x128xbf16>, vector<128x128xbf16>, vector<1x128xf32> -> vector<1x128xf32>
    %c0_57 = arith.constant 0 : index
    %c0_58 = arith.constant 0 : index
    %111 = vector.load %arg11[%c0_57, %c0_58] : memref<1x128xf32, #tpu.memory_space<vmem>>, vector<1x128xf32>
    %112 = arith.addf %110, %111 : vector<1x128xf32>
    %cst_59 = arith.constant 0.000000e+00 : f32
    %113 = vector.broadcast %cst_59 : f32 to vector<1x128xf32>
    %114 = arith.maximumf %112, %113 : vector<1x128xf32>
    %115 = arith.truncf %114 : vector<1x128xf32> to vector<1x128xbf16>
    %c0_60 = arith.constant 0 : index
    %c0_61 = arith.constant 0 : index
    %116 = vector.load %arg12[%c0_60, %c0_61] : memref<128x384xbf16, #tpu.memory_space<vmem>>, vector<128x384xbf16>
    %cst_62 = arith.constant dense<0.000000e+00> : vector<1x384xf32>
    %117 = tpu.matmul %115, %116, %cst_62 {dimension_numbers = #tpu.dot_dimension_numbers<[1], [0], [0], [1], [0, 0, 1, 1], [], []>} : vector<1x128xbf16>, vector<128x384xbf16>, vector<1x384xf32> -> vector<1x384xf32>
    %c0_63 = arith.constant 0 : index
    %c0_64 = arith.constant 0 : index
    %118 = vector.load %arg13[%c0_63, %c0_64] : memref<1x384xf32, #tpu.memory_space<vmem>>, vector<1x384xf32>
    %119 = arith.addf %117, %118 : vector<1x384xf32>
    %120 = math.tanh %119 : vector<1x384xf32>
    %c0_65 = arith.constant 0 : index
    %c0_66 = arith.constant 0 : index
    %c0_67 = arith.constant 0 : index
    %121 = vector.load %arg14[%c0_65, %c0_66, %c0_67] : memref<1x1x384xf32, #tpu.memory_space<vmem>>, vector<1x1x384xf32>
    %122 = vector.shape_cast %121 : vector<1x1x384xf32> to vector<1x384xf32>
    %123 = vector.shape_cast %120 : vector<1x384xf32> to vector<1x1x384xf32>
    tpu.vector_store %arg14[%c0_65, %c0_66, %c0_67], %123 {strides = array<i32>} : memref<1x1x384xf32, #tpu.memory_space<vmem>>, vector<1x1x384xf32>,
    return
  }
  func.func @transform_0(%arg0: i32) -> (i32, i32, i32) {
    %c0_i32 = arith.constant 0 : i32
    %c0_i32_0 = arith.constant 0 : i32
    %c0_i32_1 = arith.constant 0 : i32
    return %arg0, %c0_i32, %c0_i32_0 : i32, i32, i32
  }
  func.func @transform_1(%arg0: i32) -> (i32, i32) {
    %c0_i32 = arith.constant 0 : i32
    %c0_i32_0 = arith.constant 0 : i32
    %c0_i32_1 = arith.constant 0 : i32
    return %c0_i32, %c0_i32_0 : i32, i32
  }
  func.func @transform_2(%arg0: i32) -> (i32, i32) {
    %c0_i32 = arith.constant 0 : i32
    %c0_i32_0 = arith.constant 0 : i32
    %c0_i32_1 = arith.constant 0 : i32
    return %c0_i32, %c0_i32_0 : i32, i32
  }
  func.func @transform_3(%arg0: i32) -> (i32, i32, i32) {
    %c0_i32 = arith.constant 0 : i32
    %c0_i32_0 = arith.constant 0 : i32
    %c0_i32_1 = arith.constant 0 : i32
    %c0_i32_2 = arith.constant 0 : i32
    return %c0_i32, %c0_i32_0, %c0_i32_1 : i32, i32, i32
  }
  func.func @transform_4(%arg0: i32) -> (i32, i32) {
    %c0_i32 = arith.constant 0 : i32
    %c0_i32_0 = arith.constant 0 : i32
    %c0_i32_1 = arith.constant 0 : i32
    return %c0_i32, %c0_i32_0 : i32, i32
  }
  func.func @transform_5(%arg0: i32) -> (i32, i32) {
    %c0_i32 = arith.constant 0 : i32
    %c0_i32_0 = arith.constant 0 : i32
    %c0_i32_1 = arith.constant 0 : i32
    return %c0_i32, %c0_i32_0 : i32, i32
  }
  func.func @transform_6(%arg0: i32) -> (i32, i32) {
    %c0_i32 = arith.constant 0 : i32
    %c0_i32_0 = arith.constant 0 : i32
    %c0_i32_1 = arith.constant 0 : i32
    return %c0_i32, %c0_i32_0 : i32, i32
  }
  func.func @transform_7(%arg0: i32) -> (i32, i32) {
    %c0_i32 = arith.constant 0 : i32
    %c0_i32_0 = arith.constant 0 : i32
    %c0_i32_1 = arith.constant 0 : i32
    return %c0_i32, %c0_i32_0 : i32, i32
  }
  func.func @transform_8(%arg0: i32) -> (i32, i32) {
    %c0_i32 = arith.constant 0 : i32
    %c0_i32_0 = arith.constant 0 : i32
    %c0_i32_1 = arith.constant 0 : i32
    return %c0_i32, %c0_i32_0 : i32, i32
  }
  func.func @transform_9(%arg0: i32) -> (i32, i32) {
    %c0_i32 = arith.constant 0 : i32
    %c0_i32_0 = arith.constant 0 : i32
    %c0_i32_1 = arith.constant 0 : i32
    return %c0_i32, %c0_i32_0 : i32, i32
  }
  func.func @transform_10(%arg0: i32) -> (i32, i32) {
    %c0_i32 = arith.constant 0 : i32
    %c0_i32_0 = arith.constant 0 : i32
    %c0_i32_1 = arith.constant 0 : i32
    return %c0_i32, %c0_i32_0 : i32, i32
  }
  func.func @transform_11(%arg0: i32) -> (i32, i32) {
    %c0_i32 = arith.constant 0 : i32
    %c0_i32_0 = arith.constant 0 : i32
    %c0_i32_1 = arith.constant 0 : i32
    return %c0_i32, %c0_i32_0 : i32, i32
  }
  func.func @transform_12(%arg0: i32) -> (i32, i32) {
    %c0_i32 = arith.constant 0 : i32
    %c0_i32_0 = arith.constant 0 : i32
    %c0_i32_1 = arith.constant 0 : i32
    return %c0_i32, %c0_i32_0 : i32, i32
  }
  func.func @transform_13(%arg0: i32) -> (i32, i32, i32) {
    %c0_i32 = arith.constant 0 : i32
    %c0_i32_0 = arith.constant 0 : i32
    %c0_i32_1 = arith.constant 0 : i32
    return %arg0, %c0_i32, %c0_i32_0 : i32, i32, i32
  }
}

</mosaic_0001>

<bundles_post_ra>
// kernel: forward.1
= control target key start
LH: loop header
LB: loop body
LE: loop exit
PB: predicated region body
PF: predicated region fallthrough
CT: control target
= control target key end

     0   :  { %s3526_s25 = smov 0   ;;  %s4253_s0 = inlined_call_operand.vmem [shape: bf16[2,256,32], index: 0, kind: input, shape index: {}]   ;;  %s4254_s1 = inlined_call_operand.vmem [shape: bf16[32,32], index: 1, kind: input, shape index: {}]   ;;  %s4255_s2 = inlined_call_operand.vmem [shape: f32[1,32], index: 2, kind: input, shape index: {}]   ;;  %s4256_s3 = inlined_call_operand.vmem [shape: bf16[9,32,128], index: 3, kind: input, shape index: {}]   ;;  %s4257_s4 = inlined_call_operand.vmem [shape: f32[1,128], index: 4, kind: input, shape index: {}, may-alias: {4,6,8,10}]   ;;  %s4258_s5 = inlined_call_operand.vmem [shape: bf16[128,128], index: 5, kind: input, shape index: {}]   ;;  %s4259_s6 = inlined_call_operand.vmem [shape: f32[1,128], index: 6, kind: input, shape index: {}, may-alias: {4,6,8,10}]   ;;  %s4260_s7 = inlined_call_operand.vmem [shape: bf16[128,128], index: 7, kind: input, shape index: {}]   ;;  %s4261_s8 = inlined_call_operand.vmem [shape: f32[1,128], index: 8, kind: input, shape index: {}, may-alias: {4,6,8,10}]   ;;  %s4262_s9 = inlined_call_operand.vmem [shape: bf16[128,128], index: 9, kind: input, shape index: {}]   ;;  %s4263_s10 = inlined_call_operand.vmem [shape: f32[1,128], index: 10, kind: input, shape index: {}, may-alias: {4,6,8,10}]   ;;  %s4264_s11 = inlined_call_operand.vmem [shape: bf16[128,384], index: 11, kind: input, shape index: {}]   ;;  %s4265_s12 = inlined_call_operand.vmem [shape: f32[1,384], index: 12, kind: input, shape index: {}]   ;;  %s4266_s13 = inlined_call_operand.vmem [shape: f32[2,1,384], index: 13, kind: output, shape index: {}]  }
   0x1 LB: > { %s2757_s26 = sadd.s32 4294967295, %s3450_s25   ;;  %p2761_p0 = scmp.ge.s32.totalorder %s3450_s25, 1  ;;  %s3450_s25 = sphi %s3526_s25, %s23_s25  }
   0x2   : > { %p387_p1 = scmp.lt.s32.totalorder %s3450_s25, 3 }
   0x4   : > { %p388_p2 = pnand %p2761_p0, %p387_p1 }
   0x5   : > { %v3346_v0 = vld [vmem:[%s4254_s1] sm:$0xff] (!%p388_p2)   ;;  %p430_p3 = scmp.lt.s32.totalorder (!%p388_p2), %s2757_s26, 1  ;;  %v3347_v1 = vld [vmem:[%s4254_s1 + $0x8] sm:$0xff] (!%p388_p2)   ;;  %vm575_vm0 = vcmask (!%p388_p2), 261120   ;;  %v3364_v18 = vld [vmem:[%s4256_s3 + $0x10] sm:$0xff] (!%p388_p2)   ;;  %v3452_v19 = vmov (!%p388_p2), 0.0  }
   0x6   : > { %391 = sbr.rel (%p388_p2) target bundleno = 1547 (0x60b), region = 72  ;;  %3045 = vmatprep.subr.bf16.mxu0 (!%p388_p2), %v3346_v0  ;;  %3081 = vmatprep.subr.bf16.mxu1 (!%p388_p2), %v3364_v18  ;;  %v3365_v20 = vld [vmem:[%s4256_s3 + $0x18] sm:$0xff] (!%p388_p2)   ;;  %v3590_v21 = vld [vmem:[%s4256_s3] sm:$0xff] (!%p388_p2)   ;;  %vm916_vm1 = vcmask (!%p388_p2), 1040384   ;;  %vm966_vm2 = vcmask (!%p388_p2), 1046528   ;;  %vm3453_vm3 = vmmov (!%p388_p2), 0  }
   0x7   : > { %3046 = vmatpush3.bf16.msra.mxu0 (!%p388_p2), %v3346_v0  ;;  %3082 = vmatpush3.bf16.msra.mxu1 (!%p388_p2), %v3364_v18  ;;  %v3596_v22 = vld [vmem:[%s4255_s2] ss:$0 sm:$0xff] (!%p388_p2) }
   0x8   : > { %3047 = vmatprep.subr.bf16.mxu0 (!%p388_p2), %v3347_v1  ;;  %3083 = vmatprep.subr.bf16.mxu1 (!%p388_p2), %v3365_v20 }
   0xb   : > { %3048 = vmatpush3.bf16.msra.mxu0 (!%p388_p2), %v3347_v1  ;;  %3084 = vmatpush3.bf16.msra.mxu1 (!%p388_p2), %v3365_v20 }
   0xc   : > { %3189 = vmatprep.subr.bf16.mxu0 (!%p388_p2), %v3452_v19  ;;  %3093 = vmatprep.subr.bf16.mxu1 (!%p388_p2), %v3590_v21 }
   0xd   : > { %s4288_s26 = smov (!%p430_p3, %s2757_s26), 1 }
   0xe   : > { %s2936_s14 = sshll.u32 %s4288_s26, 7  ;;  %s3333_s29 = smul.u32 3, %s4288_s26 }
   0xf   : > { %s3546_s17 = scalar_lea.vmem %s4253_s0, %s2936_s14 }
  0x10   : > { %v3348_v2 = vld [vmem:[%s3546_s17] sm:$0xff]   ;;  %v3349_v3 = vld [vmem:[%s3546_s17 + $0x8] sm:$0xff]   ;;  %v3350_v4 = vld [vmem:[%s3546_s17 + $0x10] sm:$0xff]   ;;  %s438_s15 = scalar_lea.vmem %s4266_s13, %s3333_s29 }
  0x11   : > { %3049 = vmatprep.mubr.msk.bf16.mxu0 %vm575_vm0, %v3348_v2  ;;  %v3351_v5 = vld [vmem:[%s3546_s17 + $0x18] sm:$0xff]   ;;  %v3352_v6 = vld [vmem:[%s3546_s17 + $0x20] sm:$0xff]   ;;  %v3353_v7 = vld [vmem:[%s3546_s17 + $0x28] sm:$0xff]  }
  0x12   : > { %3050 = vmatmul.mubr.msk.bf16.vlgmr.msra.gmra.mrb[0].mxu0 %vm575_vm0, %v3349_v3  ;;  %v3354_v8 = vld [vmem:[%s3546_s17 + $0x30] sm:$0xff]   ;;  %v3355_v9 = vld [vmem:[%s3546_s17 + $0x38] sm:$0xff]   ;;  %v3356_v10 = vld [vmem:[%s3546_s17 + $0x40] sm:$0xff]  }
  0x13   : > { %3053 = vmatprep.mubr.msk.bf16.mxu0 %vm575_vm0, %v3350_v4  ;;  %v3357_v11 = vld [vmem:[%s3546_s17 + $0x48] sm:$0xff]   ;;  %v3358_v12 = vld [vmem:[%s3546_s17 + $0x50] sm:$0xff]   ;;  %v3359_v13 = vld [vmem:[%s3546_s17 + $0x58] sm:$0xff]  }
  0x14   : > { %v3360_v14 = vld [vmem:[%s3546_s17 + $0x60] sm:$0xff]   ;;  %v3361_v15 = vld [vmem:[%s3546_s17 + $0x68] sm:$0xff]   ;;  %v3362_v16 = vld [vmem:[%s3546_s17 + $0x70] sm:$0xff]  }
  0x15   : > { %v3363_v17 = vld [vmem:[%s3546_s17 + $0x78] sm:$0xff]  }
  0x1a   : > { %3054 = vmatmul.mubr.msk.bf16.gmra.mrb[4].mxu0 %vm575_vm0, %v3351_v5  ;;  %v3625_v5 = vrot.slane %v3452_v19, 7 }
  0x1b   : > { %3057 = vmatprep.mubr.msk.bf16.mxu0 %vm575_vm0, %v3352_v6  ;;  %v3382_v6 = vld [vmem:[%s4258_s5] sm:$0xff]  }
  0x1c   : > { %3190 = vmatpush3.bf16.msra.mxu0 %v3382_v6 }
  0x1d   : > { %3191 = vmatprep.subr.bf16.mxu0 %v3452_v19 }
  0x22   : > { %3058 = vmatmul.mubr.msk.bf16.gmra.mrb[8].mxu0 %vm575_vm0, %v3353_v7 }
  0x23   : > { %3061 = vmatprep.mubr.msk.bf16.mxu0 %vm575_vm0, %v3354_v8 }
  0x2a   : > { %3062 = vmatmul.mubr.msk.bf16.gmra.mrb[12].mxu0 %vm575_vm0, %v3355_v9 }
  0x2b   : > { %3065 = vmatprep.mubr.msk.bf16.mxu0 %vm575_vm0, %v3356_v10 }
  0x32   : > { %3066 = vmatmul.mubr.msk.bf16.gmra.mrb[16].mxu0 %vm575_vm0, %v3357_v11 }
  0x33   : > { %3069 = vmatprep.mubr.msk.bf16.mxu0 %vm575_vm0, %v3358_v12 }
  0x3a   : > { %3070 = vmatmul.mubr.msk.bf16.gmra.mrb[20].mxu0 %vm575_vm0, %v3359_v13 }
  0x3b   : > { %3073 = vmatprep.mubr.msk.bf16.mxu0 %vm575_vm0, %v3360_v14 }
  0x42   : > { %3074 = vmatmul.mubr.msk.bf16.gmra.mrb[24].mxu0 %vm575_vm0, %v3361_v15 }
  0x43   : > { %3077 = vmatprep.mubr.msk.bf16.mxu0 %vm575_vm0, %v3362_v16 }
  0x4a   : > { %3078 = vmatmul.mubr.msk.bf16.gmra.mrb[28].mxu0 %vm575_vm0, %v3363_v17 }
  0x4b   : > { %3205 = vmatprep.mubr.msk.bf16.mxu0 %vm3453_vm3, %v3452_v19 }
  0xe5   : > { %v3051_v23 = vpop.f32.mrb[0].mxu0 }
  0xe6   : > { %v667_v24 = vadd.f32 %v3051_v23, %v3596_v22  ;;  %v658_v25 = vpop.f32.mrb[1].mxu0 }
  0xe7   : > { %v659_v26 = vadd.f32 %v3596_v22, %v658_v25  ;;  %v3052_v27 = vpop.f32.mrb[2].mxu0  ;;  %v3635_v25 = vsel %vm916_vm1, 0.0, %v3625_v5 }
  0xe8   : > { %v787_v28 = vmax.f32 %v667_v24, 0.0  ;;  %v670_v29 = vadd.f32 %v3052_v27, %v3596_v22  ;;  %v661_v30 = vpop.f32.mrb[3].mxu0 }
  0xe9   : > { %v785_v31 = vmax.f32 %v659_v26, 0.0  ;;  %v662_v32 = vadd.f32 %v3596_v22, %v661_v30 }
  0xea   : > { %v852_v33 = vrot.slane %v787_v28, 7  ;;  %v788_v34 = vmax.f32 %v670_v29, 0.0 }
  0xeb   : > { %v850_v35 = vrot.slane %v785_v31, 7  ;;  %v786_v36 = vmax.f32 %v662_v32, 0.0 }
  0xec   : > { %v919_v37 = vsel %vm916_vm1, 0.0, %v852_v33  ;;  %v1448_v38 = vrot.slane %v852_v33, 1  ;;  %v853_v39 = vrot.slane %v788_v34, 7 }
  0xed   : > { %v1447_v40 = vrot.slane %v919_v37, 1  ;;  %v917_v41 = vsel %vm916_vm1, 0.0, %v850_v35  ;;  %v1442_v42 = vrot.slane %v850_v35, 1  ;;  %v851_v43 = vrot.slane %v786_v36, 7  ;;  %v3055_v44 = vpop.f32.mrb[4].mxu0 }
  0xee   : > { %v1441_v45 = vrot.slane %v917_v41, 1  ;;  %v920_v46 = vsel %vm916_vm1, 0.0, %v853_v39  ;;  %v1451_v47 = vrot.slane %v853_v39, 1  ;;  %v683_v48 = vadd.f32 %v3055_v44, %v3596_v22  ;;  %v674_v49 = vpop.f32.mrb[5].mxu0 }
  0xef   : > { %v1450_v50 = vrot.slane %v920_v46, 1  ;;  %v918_v51 = vsel %vm916_vm1, 0.0, %v851_v43  ;;  %v1445_v52 = vrot.slane %v851_v43, 1  ;;  %v3056_v53 = vpop.f32.mrb[6].mxu0  ;;  %v3608_v54 = vsel %vm966_vm2, %v1447_v40, %v1448_v38 }
  0xf0   : > { %v1444_v55 = vrot.slane %v918_v51, 1  ;;  %v791_v56 = vmax.f32 %v683_v48, 0.0  ;;  %v675_v57 = vadd.f32 %v3596_v22, %v674_v49  ;;  %v677_v58 = vpop.f32.mrb[7].mxu0  ;;  %v3612_v59 = vsel %vm966_vm2, %v1441_v45, %v1442_v42 }
  0xf1   : > { %v3615_v60 = vsel %vm966_vm2, %v1450_v50, %v1451_v47  ;;  %v686_v61 = vadd.f32 %v3056_v53, %v3596_v22  ;;  %v678_v62 = vadd.f32 %v3596_v22, %v677_v58  ;;  %v967_v49 = vrot.slane %v3635_v25, 1 }
  0xf2   : > { %v3622_v0 = vsel %vm966_vm2, %v1444_v55, %v1445_v52  ;;  %v856_v1 = vrot.slane %v791_v56, 7  ;;  %v789_v2 = vmax.f32 %v675_v57, 0.0 }
  0xf3   : > { %v792_v3 = vmax.f32 %v686_v61, 0.0  ;;  %v790_v4 = vmax.f32 %v678_v62, 0.0  ;;  %v968_v62 = vrot.slane %v3625_v5, 1 }
  0xf4   : > { %v923_v7 = vsel %vm916_vm1, 0.0, %v856_v1  ;;  %v854_v8 = vrot.slane %v789_v2, 7  ;;  %v1460_v10 = vrot.slane %v856_v1, 1 }
  0xf5   : > { %v1459_v9 = vrot.slane %v923_v7, 1  ;;  %v857_v11 = vrot.slane %v792_v3, 7  ;;  %v855_v12 = vrot.slane %v790_v4, 7  ;;  %v3059_v13 = vpop.f32.mrb[8].mxu0 }
  0xf6   : > { %v921_v14 = vsel %vm916_vm1, 0.0, %v854_v8  ;;  %v1454_v15 = vrot.slane %v854_v8, 1  ;;  %v699_v16 = vadd.f32 %v3059_v13, %v3596_v22  ;;  %v690_v17 = vpop.f32.mrb[9].mxu0 }
  0xf7   : > { %v1453_v18 = vrot.slane %v921_v14, 1  ;;  %v924_v20 = vsel %vm916_vm1, 0.0, %v857_v11  ;;  %v1463_v23 = vrot.slane %v857_v11, 1  ;;  %v3060_v24 = vpop.f32.mrb[10].mxu0  ;;  %v922_v27 = vsel %vm916_vm1, 0.0, %v855_v12 }
  0xf8   : > { %v1462_v26 = vrot.slane %v924_v20, 1  ;;  %v1457_v28 = vrot.slane %v855_v12, 1  ;;  %v795_v29 = vmax.f32 %v699_v16, 0.0  ;;  %v693_v30 = vpop.f32.mrb[11].mxu0  ;;  %v3639_v31 = vsel %vm966_vm2, %v1459_v9, %v1460_v10 }
  0xf9   : > { %v1456_v32 = vrot.slane %v922_v27, 1  ;;  %v691_v33 = vadd.f32 %v3596_v22, %v690_v17  ;;  %v702_v34 = vadd.f32 %v3060_v24, %v3596_v22  ;;  %v3644_v35 = vsel %vm966_vm2, %v1453_v18, %v1454_v15 }
  0xfa   : > { %v3647_v36 = vsel %vm966_vm2, %v1462_v26, %v1463_v23  ;;  %v860_v37 = vrot.slane %v795_v29, 7  ;;  %v694_v38 = vadd.f32 %v3596_v22, %v693_v30  ;;  %v3698_v26 = vsel %vm966_vm2, %v967_v49, %v968_v62 }
  0xfb   : > { %v3651_v39 = vsel %vm966_vm2, %v1456_v32, %v1457_v28  ;;  %v793_v40 = vmax.f32 %v691_v33, 0.0  ;;  %v796_v41 = vmax.f32 %v702_v34, 0.0 }
  0xfc   : > { %v3656_v43 = vsel %vm916_vm1, 0.0, %v860_v37  ;;  %v794_v44 = vmax.f32 %v694_v38, 0.0  ;;  %v1594_v51 = vrot.slane %v860_v37, 1 }
  0xfd   : > { %v858_v46 = vrot.slane %v793_v40, 7  ;;  %v861_v47 = vrot.slane %v796_v41, 7  ;;  %v3063_v48 = vpop.f32.mrb[12].mxu0  ;;  %v1593_v50 = vrot.slane %v3656_v43, 1 }
  0xfe   : > { %v859_v52 = vrot.slane %v794_v44, 7  ;;  %v715_v53 = vadd.f32 %v3063_v48, %v3596_v22  ;;  %v706_v55 = vpop.f32.mrb[13].mxu0 }
  0xff   : > { %v3664_v56 = vsel %vm916_vm1, 0.0, %v858_v46  ;;  %v1588_v57 = vrot.slane %v858_v46, 1  ;;  %v3667_v58 = vsel %vm916_vm1, 0.0, %v861_v47  ;;  %v3064_v61 = vpop.f32.mrb[14].mxu0  ;;  %v1597_v4 = vrot.slane %v861_v47, 1 }
 0x100   : > { %v1587_v1 = vrot.slane %v3664_v56, 1  ;;  %v1596_v3 = vrot.slane %v3667_v58, 1  ;;  %v709_v7 = vpop.f32.mrb[15].mxu0  ;;  %v3675_v8 = vsel %vm916_vm1, 0.0, %v859_v52  ;;  %v1591_v9 = vrot.slane %v859_v52, 1 }
 0x101   : > { %v799_v10 = vmax.f32 %v715_v53, 0.0  ;;  %v707_v11 = vadd.f32 %v3596_v22, %v706_v55  ;;  %v3679_v12 = vsel %vm966_vm2, %v1593_v50, %v1594_v51  ;;  %v1590_v14 = vrot.slane %v3675_v8, 1 }
 0x102   : > { %v3682_v5 = vsel %vm966_vm2, %v1596_v3, %v1597_v4  ;;  %v718_v18 = vadd.f32 %v3064_v61, %v3596_v22  ;;  %v3691_v20 = vsel %vm966_vm2, %v1587_v1, %v1588_v57  ;;  %v710_v24 = vadd.f32 %v3596_v22, %v709_v7 }
 0x103   : > { %v864_v16 = vrot.slane %v799_v10, 7  ;;  %v797_v17 = vmax.f32 %v707_v11, 0.0  ;;  %v3694_v23 = vsel %vm966_vm2, %v1590_v14, %v1591_v9 }
 0x104   : > { %v800_v30 = vmax.f32 %v718_v18, 0.0  ;;  %v798_v34 = vmax.f32 %v710_v24, 0.0 }
 0x105   : > { %v3701_v27 = vsel %vm916_vm1, 0.0, %v864_v16  ;;  %v1606_v28 = vrot.slane %v864_v16, 1  ;;  %v862_v29 = vrot.slane %v797_v17, 7  ;;  %v3067_v32 = vpop.f32.mrb[16].mxu0 }
 0x106   : > { %v1605_v33 = vrot.slane %v3701_v27, 1  ;;  %v731_v37 = vadd.f32 %v3067_v32, %v3596_v22  ;;  %v722_v38 = vpop.f32.mrb[17].mxu0  ;;  %v865_v46 = vrot.slane %v800_v30, 7  ;;  %v863_v51 = vrot.slane %v798_v34, 7 }
 0x107   : > { %v3708_v41 = vsel %vm916_vm1, 0.0, %v862_v29  ;;  %v1600_v44 = vrot.slane %v862_v29, 1  ;;  %v723_v47 = vadd.f32 %v3596_v22, %v722_v38  ;;  %v3068_v48 = vpop.f32.mrb[18].mxu0 }
 0x108   : > { %v3712_v49 = vsel %vm966_vm2, %v1605_v33, %v1606_v28  ;;  %v1599_v50 = vrot.slane %v3708_v41, 1  ;;  %v803_v52 = vmax.f32 %v731_v37, 0.0  ;;  %v725_v53 = vpop.f32.mrb[19].mxu0  ;;  %v3716_v55 = vsel %vm916_vm1, 0.0, %v865_v46 }
 0x109   : > { %v1609_v57 = vrot.slane %v865_v46, 1  ;;  %v801_v61 = vmax.f32 %v723_v47, 0.0  ;;  %v734_v62 = vadd.f32 %v3068_v48, %v3596_v22  ;;  %v1608_v4 = vrot.slane %v3716_v55, 1 }
 0x10a   : > { %v3720_v1 = vsel %vm966_vm2, %v1599_v50, %v1600_v44  ;;  %v3726_v7 = vsel %vm916_vm1, 0.0, %v863_v51  ;;  %v1603_v11 = vrot.slane %v863_v51, 1  ;;  %v869_v14 = vrot.slane %v803_v52, 7 }
 0x10b   : > { %v1602_v10 = vrot.slane %v3726_v7, 1  ;;  %v3732_v16 = vsel %vm966_vm2, %v1608_v4, %v1609_v57  ;;  %v867_v17 = vrot.slane %v801_v61, 7  ;;  %v804_v18 = vmax.f32 %v734_v62, 0.0 }
 0x10c   : > { %v726_v24 = vadd.f32 %v3596_v22, %v725_v53  ;;  %v936_v29 = vsel %vm916_vm1, 0.0, %v869_v14  ;;  %v977_v30 = vrot.slane %v869_v14, 1 }
 0x10d   : > { %v3736_v28 = vsel %vm966_vm2, %v1602_v10, %v1603_v11  ;;  %v3071_v32 = vpop.f32.mrb[20].mxu0  ;;  %v976_v34 = vrot.slane %v936_v29, 1  ;;  %v934_v37 = vsel %vm916_vm1, 0.0, %v867_v17  ;;  %v971_v38 = vrot.slane %v867_v17, 1 }
 0x10e   : > { %v870_v44 = vrot.slane %v804_v18, 7  ;;  %v738_v46 = vpop.f32.mrb[21].mxu0  ;;  %v970_v47 = vrot.slane %v934_v37, 1  ;;  %v802_v48 = vmax.f32 %v726_v24, 0.0  ;;  %v747_v50 = vadd.f32 %v3071_v32, %v3596_v22 }
 0x10f   : > { %v739_v51 = vadd.f32 %v3596_v22, %v738_v46  ;;  %v3072_v52 = vpop.f32.mrb[22].mxu0  ;;  %v3747_v4 = vsel %vm966_vm2, %v976_v34, %v977_v30 }
 0x110   : > { %v937_v53 = vsel %vm916_vm1, 0.0, %v870_v44  ;;  %v980_v57 = vrot.slane %v870_v44, 1  ;;  %v750_v61 = vadd.f32 %v3072_v52, %v3596_v22  ;;  %v741_v62 = vpop.f32.mrb[23].mxu0  ;;  %v868_v11 = vrot.slane %v802_v48, 7 }
 0x111   : > { %v979_v10 = vrot.slane %v937_v53, 1  ;;  %v807_v14 = vmax.f32 %v747_v50, 0.0  ;;  %v805_v17 = vmax.f32 %v739_v51, 0.0  ;;  %v742_v24 = vadd.f32 %v3596_v22, %v741_v62 }
 0x112   : > { %v808_v18 = vmax.f32 %v750_v61, 0.0  ;;  %v3751_v29 = vsel %vm966_vm2, %v970_v47, %v971_v38  ;;  %v935_v44 = vsel %vm916_vm1, 0.0, %v868_v11  ;;  %v974_v30 = vrot.slane %v868_v11, 1 }
 0x113   : > { %v3756_v37 = vsel %vm966_vm2, %v979_v10, %v980_v57  ;;  %v873_v34 = vrot.slane %v807_v14, 7  ;;  %v973_v46 = vrot.slane %v935_v44, 1  ;;  %v871_v48 = vrot.slane %v805_v17, 7 }
 0x114   : > { %v874_v50 = vrot.slane %v808_v18, 7  ;;  %v806_v51 = vmax.f32 %v742_v24, 0.0  ;;  %v999_v38 = vpack.c.bf16 %v3751_v29, %v3698_v26 }
 0x115   : > { %v940_v52 = vsel %vm916_vm1, 0.0, %v873_v34  ;;  %v989_v53 = vrot.slane %v873_v34, 1  ;;  %v3075_v61 = vpop.f32.mrb[24].mxu0  ;;  %v938_v62 = vsel %vm916_vm1, 0.0, %v871_v48  ;;  %v983_v10 = vrot.slane %v871_v48, 1 }
 0x116   : > { %v988_v57 = vrot.slane %v940_v52, 1  ;;  %v941_v11 = vsel %vm916_vm1, 0.0, %v874_v50  ;;  %v754_v14 = vpop.f32.mrb[25].mxu0  ;;  %v982_v17 = vrot.slane %v938_v62, 1  ;;  %v1833_v24 = vrot.slane %v874_v50, 1  ;;  %3085 = vmatprep.mubr.msk.bf16.mxu1 %vm575_vm0, %v999_v38 }
 0x117   : > { %v1832_v18 = vrot.slane %v941_v11, 1  ;;  %v872_v44 = vrot.slane %v806_v51, 7  ;;  %v3076_v34 = vpop.f32.mrb[26].mxu0  ;;  %v3771_v47 = vsel %vm966_vm2, %v973_v46, %v974_v30  ;;  %v763_v52 = vadd.f32 %v3075_v61, %v3596_v22  ;;  %v3367_v61 = vld [vmem:[%s4256_s3 + $0x8] sm:$0xff]  }
 0x118   : > { %v3768_v33 = vsel %vm966_vm2, %v988_v57, %v989_v53  ;;  %v755_v48 = vadd.f32 %v3596_v22, %v754_v14  ;;  %v757_v32 = vpop.f32.mrb[27].mxu0  ;;  %v3776_v15 = vsel %vm966_vm2, %v982_v17, %v983_v10  ;;  %v1000_v53 = vpack.c.bf16 %v3747_v4, %v3771_v47 }
 0x119   : > { %v3779_v50 = vsel %vm966_vm2, %v1832_v18, %v1833_v24  ;;  %v939_v51 = vsel %vm916_vm1, 0.0, %v872_v44  ;;  %v986_v38 = vrot.slane %v872_v44, 1  ;;  %v811_v46 = vmax.f32 %v763_v52, 0.0 }
 0x11a   : > { %v985_v62 = vrot.slane %v939_v51, 1  ;;  %v809_v57 = vmax.f32 %v755_v48, 0.0  ;;  %v766_v10 = vadd.f32 %v3076_v34, %v3596_v22  ;;  %v758_v11 = vadd.f32 %v3596_v22, %v757_v32  ;;  %3086 = vmatmul.mubr.msk.bf16.vlgmr.msra.gmra.mrb[0].mxu1 %vm575_vm0, %v1000_v53 }
 0x11b   : > { %v1001_v14 = vpack.c.bf16 %v3776_v15, %v3756_v37  ;;  %v877_v18 = vrot.slane %v811_v46, 7  ;;  %3094 = vmatpush3.bf16.msra.mxu1 %v3590_v21  ;;  %v3810_v21 = vld [vmem:[%s4256_s3 + $0x20] sm:$0xff]  }
 0x11c   : > { %v3794_v17 = vsel %vm966_vm2, %v985_v62, %v986_v38  ;;  %v875_v44 = vrot.slane %v809_v57, 7  ;;  %v812_v52 = vmax.f32 %v766_v10, 0.0  ;;  %v810_v48 = vmax.f32 %v758_v11, 0.0  ;;  %3095 = vmatprep.subr.bf16.mxu1 %v3367_v61 }
 0x11d   : > { %3089 = vmatprep.mubr.msk.bf16.mxu1 %vm575_vm0, %v1001_v14  ;;  %v3079_v32 = vpop.f32.mrb[28].mxu0  ;;  %v1002_v34 = vpack.c.bf16 %v3768_v33, %v3794_v17  ;;  %v3804_v51 = vsel %vm916_vm1, 0.0, %v877_v18  ;;  %v1200_v38 = vrot.slane %v877_v18, 1 }
 0x11e   : > { %v779_v62 = vadd.f32 %v3079_v32, %v3596_v22  ;;  %v770_v53 = vpop.f32.mrb[29].mxu0  ;;  %v1199_v57 = vrot.slane %v3804_v51, 1  ;;  %v3816_v10 = vsel %vm916_vm1, 0.0, %v875_v44  ;;  %v1194_v11 = vrot.slane %v875_v44, 1 }
 0x11f   : > { %v878_v14 = vrot.slane %v812_v52, 7  ;;  %v3080_v18 = vpop.f32.mrb[30].mxu0  ;;  %v950_v32 = vpack.c.bf16 %v3816_v10, %v3635_v25  ;;  %v1193_v24 = vrot.slane %v3816_v10, 1  ;;  %v876_v30 = vrot.slane %v810_v48, 7  ;;  %3096 = vmatpush3.bf16.msra.mxu1 %v3367_v61 }
 0x120   : > { %v815_v40 = vmax.f32 %v779_v62, 0.0  ;;  %v773_v42 = vpop.f32.mrb[31].mxu0  ;;  %v3822_v45 = vsel %vm966_vm2, %v1199_v57, %v1200_v38  ;;  %v771_v44 = vadd.f32 %v3596_v22, %v770_v53  ;;  %3105 = vmatprep.subr.bf16.mxu1 %v3810_v21  ;;  %v782_v48 = vadd.f32 %v3080_v18, %v3596_v22 }
 0x121   : > { %v3825_v46 = vsel %vm916_vm1, 0.0, %v878_v14  ;;  %v1203_v63 = vrot.slane %v878_v14, 1  ;;  %v3829_v52 = vsel %vm966_vm2, %v1193_v24, %v1194_v11  ;;  %v3835_v62 = vsel %vm916_vm1, 0.0, %v876_v30 }
 0x122   : > { %v1202_v25 = vrot.slane %v3825_v46, 1  ;;  %v951_v38 = vpack.c.bf16 %v3804_v51, %v3835_v62  ;;  %v1196_v61 = vrot.slane %v3835_v62, 1  ;;  %v1197_v57 = vrot.slane %v876_v30, 1  ;;  %3090 = vmatmul.mubr.msk.bf16.gmra.mrb[4].mxu1 %vm575_vm0, %v1002_v34 }
 0x123   : > { %v881_v11 = vrot.slane %v815_v40, 7  ;;  %v813_v14 = vmax.f32 %v771_v44, 0.0  ;;  %v774_v24 = vadd.f32 %v3596_v22, %v773_v42  ;;  %3097 = vmatprep.mubr.msk.bf16.mxu1 %vm575_vm0, %v950_v32  ;;  %v3383_v44 = vld [vmem:[%s4258_s5 + $0x8] sm:$0xff]  }
 0x124   : > { %v3844_v53 = vsel %vm966_vm2, %v1202_v25, %v1203_v63  ;;  %v3854_v30 = vsel %vm966_vm2, %v1196_v61, %v1197_v57  ;;  %v816_v61 = vmax.f32 %v782_v48, 0.0  ;;  %v3369_v48 = vld [vmem:[%s4256_s3 + $0x28] sm:$0xff]   ;;  %3192 = vmatpush3.bf16.msra.mxu0 %v3383_v44 }
 0x125   : > { %v1222_v63 = vpack.c.bf16 %v3822_v45, %v3854_v30  ;;  %v3861_v40 = vsel %vm916_vm1, 0.0, %v881_v11  ;;  %v1212_v34 = vrot.slane %v881_v11, 1  ;;  %v879_v18 = vrot.slane %v813_v14, 7  ;;  %3193 = vmatprep.subr.bf16.mxu0 %v3452_v19 }
 0x126   : > { %v1211_v25 = vrot.slane %v3861_v40, 1  ;;  %v814_v57 = vmax.f32 %v774_v24, 0.0  ;;  %v882_v14 = vrot.slane %v816_v61, 7  ;;  %v3384_v24 = vld [vmem:[%s4258_s5 + $0x10] sm:$0xff]  }
 0x127   : > { %v3871_v42 = vsel %vm916_vm1, 0.0, %v879_v18  ;;  %v1206_v32 = vrot.slane %v879_v18, 1 }
 0x128   : > { %v952_v6 = vpack.c.bf16 %v3871_v42, %v3825_v46  ;;  %v1205_v11 = vrot.slane %v3871_v42, 1  ;;  %v880_v3 = vrot.slane %v814_v57, 7  ;;  %v3883_v22 = vsel %vm966_vm2, %v1211_v25, %v1212_v34  ;;  %3194 = vmatpush3.bf16.msra.mxu0 %v3384_v24 }
 0x129   : > { %v3889_v9 = vsel %vm916_vm1, 0.0, %v882_v14  ;;  %v1944_v61 = vrot.slane %v882_v14, 1  ;;  %3195 = vmatprep.subr.bf16.mxu0 %v3452_v19  ;;  %v1221_v24 = vpack.c.bf16 %v3829_v52, %v3698_v26  ;;  %v3372_v26 = vld [vmem:[%s4256_s3 + $0x40] sm:$0xff]  }
 0x12a   : > { %v3886_v18 = vsel %vm966_vm2, %v1205_v11, %v1206_v32  ;;  %v1728_v57 = vpack.c.bf16 %v3889_v9, %v3861_v40  ;;  %v1943_v44 = vrot.slane %v3889_v9, 1  ;;  %v3896_v2 = vsel %vm916_vm1, 0.0, %v880_v3  ;;  %3098 = vmatmul.mubr.msk.bf16.vlgmr.msra.gmra.mrb[0].mxu1 %vm575_vm0, %v951_v38  ;;  %v3385_v38 = vld [vmem:[%s4258_s5 + $0x18] sm:$0xff]  }
 0x12b   : > { %v1209_v13 = vrot.slane %v880_v3, 1  ;;  %v953_v34 = vpack.c.bf16 %v3861_v40, %v3896_v2  ;;  %v1208_v25 = vrot.slane %v3896_v2, 1  ;;  %v1727_v32 = vpack.c.bf16 %v3896_v2, %v3871_v42  ;;  %3106 = vmatpush3.bf16.msra.mxu1 %v3810_v21  ;;  %3101 = vmatprep.mubr.msk.bf16.mxu1 %vm575_vm0, %v952_v6  ;;  %v3370_v3 = vld [vmem:[%s4256_s3 + $0x30] sm:$0xff]   ;;  %v3381_v2 = vld [vmem:[%s4256_s3 + $0x88] sm:$0xff]  }
 0x12c   : > { %v1223_v11 = vpack.c.bf16 %v3886_v18, %v3844_v53  ;;  %v3909_v14 = vsel %vm966_vm2, %v1943_v44, %v1944_v61  ;;  %3107 = vmatprep.subr.bf16.mxu1 %v3369_v48  ;;  %3196 = vmatpush3.bf16.msra.mxu0 %v3385_v38  ;;  %v4285_v9 = vpack.c.bf16 %v3854_v30, %v3829_v52 }
 0x12d   : > { %v3918_v21 = vsel %vm966_vm2, %v1208_v25, %v1209_v13  ;;  %v1950_v6 = vpack.c.bf16 %v3909_v14, %v3883_v22  ;;  %3197 = vmatprep.subr.bf16.mxu0 %v3452_v19  ;;  %v3371_v13 = vld [vmem:[%s4256_s3 + $0x38] sm:$0xff]   ;;  %v4269_v25 = vpack.c.bf16 %v3726_v7, %v3708_v41  ;;  %v4272_v41 = vpack.c.bf16 %v3615_v60, %v3608_v54  ;;  %v3377_v60 = vld [vmem:[%s4256_s3 + $0x68] sm:$0xff]  }
 0x12e   : > { %v1224_v61 = vpack.c.bf16 %v3883_v22, %v3918_v21  ;;  %v1949_v44 = vpack.c.bf16 %v3918_v21, %v3886_v18  ;;  %v4275_v54 = vpack.c.bf16 %v3694_v23, %v3691_v20  ;;  %v4280_v20 = vpack.c.bf16 %v3825_v46, %v3804_v51  ;;  %v3380_v23 = vld [vmem:[%s4256_s3 + $0x80] sm:$0xff]  }
 0x12f   : > { %3108 = vmatpush3.bf16.msra.mxu1 %v3369_v48  ;;  %v4267_v48 = vpack.c.bf16 %v3675_v8, %v3664_v56  ;;  %v3374_v56 = vld [vmem:[%s4256_s3 + $0x50] sm:$0xff]   ;;  %v4270_v8 = vpack.c.bf16 %v3716_v55, %v3701_v27  ;;  %v4273_v27 = vpack.c.bf16 %v3651_v39, %v3644_v35  ;;  %v4276_v35 = vpack.c.bf16 %v3682_v5, %v3679_v12  ;;  %v3379_v5 = vld [vmem:[%s4256_s3 + $0x78] sm:$0xff]  }
 0x130   : > { %3117 = vmatprep.subr.bf16.mxu1 %v3370_v3  ;;  %v4278_v39 = vpack.c.bf16 %v3732_v16, %v3712_v49  ;;  %v4279_v12 = vpack.c.bf16 %v3835_v62, %v3816_v10  ;;  %v4281_v49 = vpack.c.bf16 %v3771_v47, %v3751_v29  ;;  %v4282_v55 = vpack.c.bf16 %v3756_v37, %v3747_v4  ;;  %v2885_v4 = vld [vmem:[%s4257_s4] ss:$0 sm:$0xff] }
 0x131   : > { %v4284_v7 = vpack.c.bf16 %v3779_v50, %v3768_v33  ;;  %v4286_v16 = vpack.c.bf16 %v3844_v53, %v3822_v45  ;;  %v3387_v45 = vld [vmem:[%s4258_s5 + $0x28] sm:$0xff]   ;;  %v3389_v33 = vld [vmem:[%s4258_s5 + $0x38] sm:$0xff]  }
 0x132   : > { %3102 = vmatmul.mubr.msk.bf16.gmra.mrb[4].mxu1 %vm575_vm0, %v953_v34  ;;  %v4268_v34 = vpack.c.bf16 %v3667_v58, %v3656_v43  ;;  %v4271_v43 = vpack.c.bf16 %v3622_v0, %v3612_v59  ;;  %v3375_v58 = vld [vmem:[%s4256_s3 + $0x58] sm:$0xff]   ;;  %v3376_v59 = vld [vmem:[%s4256_s3 + $0x60] sm:$0xff]   ;;  %v4274_v0 = vpack.c.bf16 %v3647_v36, %v3639_v31  ;;  %v4277_v31 = vpack.c.bf16 %v3736_v28, %v3720_v1  ;;  %v3378_v36 = vld [vmem:[%s4256_s3 + $0x70] sm:$0xff]  }
 0x133   : > { %3109 = vmatprep.mubr.msk.bf16.mxu1 %vm575_vm0, %v1221_v24  ;;  %v4283_v1 = vpack.c.bf16 %v3794_v17, %v3776_v15  ;;  %v3386_v15 = vld [vmem:[%s4258_s5 + $0x20] sm:$0xff]   ;;  %v3388_v28 = vld [vmem:[%s4258_s5 + $0x30] sm:$0xff]  }
 0x134   : > { %3198 = vmatpush3.bf16.msra.mxu0 %v3386_v15  ;;  %v3402_v15 = vld [vmem:[%s4262_s9 + $0x20] sm:$0xff]  }
 0x135   : > { %3199 = vmatprep.subr.bf16.mxu0 %v3452_v19 }
 0x138   : > { %3200 = vmatpush3.bf16.msra.mxu0 %v3387_v45  ;;  %v3403_v45 = vld [vmem:[%s4262_s9 + $0x28] sm:$0xff]  }
 0x139   : > { %3201 = vmatprep.subr.bf16.mxu0 %v3452_v19 }
 0x13a   : > { %3110 = vmatmul.mubr.msk.bf16.vlgmr.msra.gmra.mrb[0].mxu1 %vm575_vm0, %v1222_v63  ;;  %v3373_v63 = vld [vmem:[%s4256_s3 + $0x48] sm:$0xff]  }
 0x13b   : > { %3118 = vmatpush3.bf16.msra.mxu1 %v3370_v3  ;;  %3113 = vmatprep.mubr.msk.bf16.mxu1 %vm575_vm0, %v1223_v11 }
 0x13c   : > { %3119 = vmatprep.subr.bf16.mxu1 %v3371_v13  ;;  %3202 = vmatpush3.bf16.msra.mxu0 %v3388_v28  ;;  %v3404_v28 = vld [vmem:[%s4262_s9 + $0x30] sm:$0xff]  }
 0x13d   : > { %3203 = vmatprep.subr.bf16.mxu0 %v3452_v19 }
 0x13f   : > { %3120 = vmatpush3.bf16.msra.mxu1 %v3371_v13 }
 0x140   : > { %3129 = vmatprep.subr.bf16.mxu1 %v3372_v26  ;;  %3204 = vmatpush3.bf16.msra.mxu0 %v3389_v33  ;;  %v3405_v33 = vld [vmem:[%s4262_s9 + $0x38] sm:$0xff]  }
 0x141   : > { %3209 = vmatprep.subr.bf16.mxu0 %v3452_v19 }
 0x142   : > { %3114 = vmatmul.mubr.msk.bf16.gmra.mrb[4].mxu1 %vm575_vm0, %v1224_v61 }
 0x143   : > { %3121 = vmatprep.mubr.msk.bf16.mxu1 %vm575_vm0, %v4267_v48 }
 0x14a   : > { %3122 = vmatmul.mubr.msk.bf16.vlgmr.msra.gmra.mrb[0].mxu1 %vm575_vm0, %v4268_v34 }
 0x14b   : > { %3130 = vmatpush3.bf16.msra.mxu1 %v3372_v26  ;;  %3125 = vmatprep.mubr.msk.bf16.mxu1 %vm575_vm0, %v4269_v25 }
 0x14c   : > { %3131 = vmatprep.subr.bf16.mxu1 %v3373_v63 }
 0x14f   : > { %3132 = vmatpush3.bf16.msra.mxu1 %v3373_v63 }
 0x150   : > { %3141 = vmatprep.subr.bf16.mxu1 %v3374_v56 }
 0x152   : > { %3126 = vmatmul.mubr.msk.bf16.gmra.mrb[4].mxu1 %vm575_vm0, %v4270_v8 }
 0x153   : > { %3133 = vmatprep.mubr.msk.bf16.mxu1 %vm575_vm0, %v4271_v43 }
 0x15a   : > { %3134 = vmatmul.mubr.msk.bf16.vlgmr.msra.gmra.mrb[0].mxu1 %vm575_vm0, %v4272_v41 }
 0x15b   : > { %3142 = vmatpush3.bf16.msra.mxu1 %v3374_v56  ;;  %3137 = vmatprep.mubr.msk.bf16.mxu1 %vm575_vm0, %v4273_v27  ;;  %v3390_v27 = vld [vmem:[%s4260_s7] sm:$0xff]  }
 0x15c   : > { %3143 = vmatprep.subr.bf16.mxu1 %v3375_v58 }
 0x15f   : > { %3144 = vmatpush3.bf16.msra.mxu1 %v3375_v58 }
 0x160   : > { %3153 = vmatprep.subr.bf16.mxu1 %v3376_v59 }
 0x162   : > { %3138 = vmatmul.mubr.msk.bf16.gmra.mrb[4].mxu1 %vm575_vm0, %v4274_v0  ;;  %v3391_v0 = vld [vmem:[%s4260_s7 + $0x8] sm:$0xff]  }
 0x163   : > { %3145 = vmatprep.mubr.msk.bf16.mxu1 %vm575_vm0, %v4275_v54  ;;  %v3392_v54 = vld [vmem:[%s4260_s7 + $0x10] sm:$0xff]  }
 0x16a   : > { %3146 = vmatmul.mubr.msk.bf16.vlgmr.msra.gmra.mrb[0].mxu1 %vm575_vm0, %v4276_v35  ;;  %v3394_v35 = vld [vmem:[%s4260_s7 + $0x20] sm:$0xff]  }
 0x16b   : > { %3154 = vmatpush3.bf16.msra.mxu1 %v3376_v59  ;;  %3149 = vmatprep.mubr.msk.bf16.mxu1 %vm575_vm0, %v4277_v31  ;;  %v3395_v31 = vld [vmem:[%s4260_s7 + $0x28] sm:$0xff]  }
 0x16c   : > { %3155 = vmatprep.subr.bf16.mxu1 %v3377_v60 }
 0x16f   : > { %3156 = vmatpush3.bf16.msra.mxu1 %v3377_v60  ;;  %v3393_v60 = vld [vmem:[%s4260_s7 + $0x18] sm:$0xff]  }
 0x170   : > { %3165 = vmatprep.subr.bf16.mxu1 %v3378_v36 }
 0x172   : > { %3150 = vmatmul.mubr.msk.bf16.gmra.mrb[4].mxu1 %vm575_vm0, %v4278_v39  ;;  %v3397_v39 = vld [vmem:[%s4260_s7 + $0x38] sm:$0xff]  }
 0x173   : > { %3157 = vmatprep.mubr.msk.bf16.mxu1 %vm575_vm0, %v4279_v12  ;;  %v2107_v12 = vld [vmem:[%s4259_s6] sm:$0x1] }
 0x17a   : > { %3158 = vmatmul.mubr.msk.bf16.vlgmr.msra.gmra.mrb[0].mxu1 %vm575_vm0, %v4280_v20 }
 0x17b   : > { %3166 = vmatpush3.bf16.msra.mxu1 %v3378_v36  ;;  %3161 = vmatprep.mubr.msk.bf16.mxu1 %vm575_vm0, %v1727_v32  ;;  %v3396_v36 = vld [vmem:[%s4260_s7 + $0x30] sm:$0xff]  }
 0x17c   : > { %3167 = vmatprep.subr.bf16.mxu1 %v3379_v5 }
 0x17f   : > { %3168 = vmatpush3.bf16.msra.mxu1 %v3379_v5 }
 0x180   : > { %3177 = vmatprep.subr.bf16.mxu1 %v3380_v23 }
 0x182   : > { %3162 = vmatmul.mubr.msk.bf16.gmra.mrb[4].mxu1 %vm575_vm0, %v1728_v57 }
 0x183   : > { %3169 = vmatprep.mubr.msk.bf16.mxu1 %vm575_vm0, %v4281_v49 }
 0x18a   : > { %3170 = vmatmul.mubr.msk.bf16.vlgmr.msra.gmra.mrb[0].mxu1 %vm575_vm0, %v4282_v55 }
 0x18b   : > { %3178 = vmatpush3.bf16.msra.mxu1 %v3380_v23  ;;  %3173 = vmatprep.mubr.msk.bf16.mxu1 %vm575_vm0, %v4283_v1 }
 0x18c   : > { %3179 = vmatprep.subr.bf16.mxu1 %v3381_v2 }
 0x18f   : > { %3180 = vmatpush3.bf16.msra.mxu1 %v3381_v2  ;;  %v3398_v2 = vld [vmem:[%s4262_s9] sm:$0xff]  }
 0x190   : > { %3249 = vmatprep.subr.bf16.mxu1 %v3452_v19 }
 0x192   : > { %3174 = vmatmul.mubr.msk.bf16.gmra.mrb[4].mxu1 %vm575_vm0, %v4284_v7  ;;  %v3399_v7 = vld [vmem:[%s4262_s9 + $0x8] sm:$0xff]  }
 0x193   : > { %3181 = vmatprep.mubr.msk.bf16.mxu1 %vm575_vm0, %v4285_v9  ;;  %v3400_v9 = vld [vmem:[%s4262_s9 + $0x10] sm:$0xff]  }
 0x19a   : > { %3182 = vmatmul.mubr.msk.bf16.vlgmr.msra.gmra.mrb[0].mxu1 %vm575_vm0, %v4286_v16  ;;  %v3401_v16 = vld [vmem:[%s4262_s9 + $0x18] sm:$0xff]  }
 0x19b   : > { %3185 = vmatprep.mubr.msk.bf16.mxu1 %vm575_vm0, %v1949_v44 }
 0x1a2   : > { %3186 = vmatmul.mubr.msk.bf16.gmra.mrb[4].mxu1 %vm575_vm0, %v1950_v6 }
 0x1a3   : > { %3265 = vmatprep.mubr.msk.bf16.mxu1 %vm3453_vm3, %v3452_v19 }
 0x26d   : > { %v3183_v29 = vpop.f32.mrb[0].mxu1 }
 0x26e   : > { %v2014_v37 = vpop.f32.mrb[1].mxu1  ;;  %v2062_v51 = vadd.f32 %v3183_v29, %v2885_v4  ;;  %v3409_v29 = vld [vmem:[%s4264_s11 + $0x8] ss:$12 sps:$4 sm:$0xff]  }
 0x26f   : > { %v2060_v47 = vadd.f32 %v2885_v4, %v2014_v37  ;;  %v3184_v50 = vpop.f32.mrb[2].mxu1  ;;  %3250 = vmatpush3.bf16.msra.mxu1 %v3409_v29  ;;  %v3413_v37 = vld [vmem:[%s4264_s11 + $0x20] ss:$12 sps:$4 sm:$0xff]  }
 0x270   : > { %v2017_v17 = vpop.f32.mrb[3].mxu1  ;;  %v2063_v52 = vadd.f32 %v3184_v50, %v2885_v4  ;;  %v2070_v53 = vmax.f32 %v2062_v51, 0.0  ;;  %3251 = vmatprep.subr.bf16.mxu1 %v3452_v19  ;;  %v3421_v50 = vld [vmem:[%s4264_s11 + $0x50] ss:$12 sps:$4 sm:$0xff]   ;;  %v3429_v51 = vld [vmem:[%s4264_s11 + $0x80] ss:$12 sps:$4 sm:$0xff]  }
 0x271   : > { %v2061_v46 = vadd.f32 %v2885_v4, %v2017_v17  ;;  %v2068_v10 = vmax.f32 %v2060_v47, 0.0  ;;  %v3417_v47 = vld [vmem:[%s4264_s11 + $0x38] ss:$12 sps:$4 sm:$0xff]   ;;  %v3425_v17 = vld [vmem:[%s4264_s11 + $0x68] ss:$12 sps:$4 sm:$0xff]  }
 0x272   : > { %v2071_v42 = vmax.f32 %v2063_v52, 0.0 }
 0x273   : > { %v2069_v62 = vmax.f32 %v2061_v46, 0.0  ;;  %3252 = vmatpush3.bf16.msra.mxu1 %v3413_v37  ;;  %v2213_v46 = vld [vmem:[%s4261_s8] sm:$0x1] }
 0x274   : > { %3253 = vmatprep.subr.bf16.mxu1 %v3452_v19 }
 0x275   : > { %v2076_v30 = vadd.f32 %v2069_v62, %v2068_v10  ;;  %v3187_v40 = vpop.f32.mrb[4].mxu1 }
 0x276   : > { %v2030_v22 = vpop.f32.mrb[5].mxu1  ;;  %v2066_v14 = vadd.f32 %v3187_v40, %v2885_v4 }
 0x277   : > { %v2077_v18 = vadd.f32 %v2076_v30, %v2070_v53  ;;  %v2064_v57 = vadd.f32 %v2885_v4, %v2030_v22  ;;  %v3188_v32 = vpop.f32.mrb[6].mxu1  ;;  %3254 = vmatpush3.bf16.msra.mxu1 %v3417_v47  ;;  %v3406_v22 = vld [vmem:[%s4264_s11] ss:$12 sps:$4 sm:$0xff]  }
 0x278   : > { %v2033_v11 = vpop.f32.mrb[7].mxu1  ;;  %v2067_v61 = vadd.f32 %v3188_v32, %v2885_v4  ;;  %v2074_v24 = vmax.f32 %v2066_v14, 0.0  ;;  %3255 = vmatprep.subr.bf16.mxu1 %v3452_v19  ;;  %v3416_v32 = vld [vmem:[%s4264_s11 + $0x34] ss:$12 sps:$4 sm:$0xff]   ;;  %v3420_v14 = vld [vmem:[%s4264_s11 + $0x4c] ss:$12 sps:$4 sm:$0xff]  }
 0x279   : > { %v2072_v3 = vmax.f32 %v2064_v57, 0.0  ;;  %v2078_v38 = vadd.f32 %v2077_v18, %v2071_v42  ;;  %v2065_v21 = vadd.f32 %v2885_v4, %v2033_v11  ;;  %v3408_v4 = vld [vmem:[%s4264_s11 + $0x4] ss:$12 sps:$4 sm:$0xff]   ;;  %v3412_v18 = vld [vmem:[%s4264_s11 + $0x1c] ss:$12 sps:$4 sm:$0xff]  }
 0x27a   : > { %v2075_v26 = vmax.f32 %v2067_v61, 0.0  ;;  %v3410_v57 = vld [vmem:[%s4264_s11 + $0x18] ss:$12 sps:$4 sm:$0xff]   ;;  %v3414_v11 = vld [vmem:[%s4264_s11 + $0x30] ss:$12 sps:$4 sm:$0xff]  }
 0x27b   : > { %v2079_v6 = vadd.f32 %v2078_v38, %v2072_v3  ;;  %v2073_v44 = vmax.f32 %v2065_v21, 0.0  ;;  %3256 = vmatpush3.bf16.msra.mxu1 %v3421_v50  ;;  %v3418_v3 = vld [vmem:[%s4264_s11 + $0x48] ss:$12 sps:$4 sm:$0xff]   ;;  %v3424_v38 = vld [vmem:[%s4264_s11 + $0x64] ss:$12 sps:$4 sm:$0xff]  }
 0x27c   : > { %3257 = vmatprep.subr.bf16.mxu1 %v3452_v19  ;;  %v3422_v21 = vld [vmem:[%s4264_s11 + $0x60] ss:$12 sps:$4 sm:$0xff]   ;;  %v3426_v61 = vld [vmem:[%s4264_s11 + $0x78] ss:$12 sps:$4 sm:$0xff]  }
 0x27d   : > { %v2080_v13 = vadd.f32 %v2079_v6, %v2073_v44  ;;  %v3428_v6 = vld [vmem:[%s4264_s11 + $0x7c] ss:$12 sps:$4 sm:$0xff]   ;;  %v3432_v44 = vld [vmem:[%s4264_s11 + $0x94] ss:$12 sps:$4 sm:$0xff]  }
 0x27f   : > { %v2081_v48 = vadd.f32 %v2080_v13, %v2074_v24  ;;  %3258 = vmatpush3.bf16.msra.mxu1 %v3425_v17  ;;  %v3430_v24 = vld [vmem:[%s4264_s11 + $0x90] ss:$12 sps:$4 sm:$0xff]   ;;  %v3433_v13 = vld [vmem:[%s4264_s11 + $0x98] ss:$12 sps:$4 sm:$0xff]  }
 0x280   : > { %3259 = vmatprep.subr.bf16.mxu1 %v3452_v19 }
 0x281   : > { %v2082_v63 = vadd.f32 %v2081_v48, %v2075_v26  ;;  %v3436_v26 = vld [vmem:[%s4264_s11 + $0xac] ss:$12 sps:$4 sm:$0xff]   ;;  %v3434_v48 = vld [vmem:[%s4264_s11 + $0xa8] ss:$12 sps:$4 sm:$0xff]  }
 0x283   : > { %v2083_v34 = vrot.slane %v2082_v63, 4  ;;  %3260 = vmatpush3.bf16.msra.mxu1 %v3429_v51 }
 0x284   : > { %3261 = vmatprep.subr.bf16.mxu1 %v3452_v19 }
 0x285   : > { %v2084_v25 = vadd.f32 %v2083_v34, %v2082_v63  ;;  %v3437_v63 = vld [vmem:[%s4264_s11 + $0xb0] ss:$12 sps:$4 sm:$0xff]   ;;  %v3454_v34 = vmov 0  }
 0x287   : > { %v2085_v56 = vrot.slane %v2084_v25, 2  ;;  %3262 = vmatpush3.bf16.msra.mxu1 %v3433_v13 }
 0x288   : > { %3263 = vmatprep.subr.bf16.mxu1 %v3452_v19 }
 0x289   : > { %v2086_v8 = vadd.f32 %v2085_v56, %v2084_v25  ;;  %v2320_v25 = vld [vmem:[%s4263_s10] sm:$0x1] }
 0x28b   : > { %v2087_v43 = vrot.slane %v2086_v8, 1  ;;  %3264 = vmatpush3.bf16.msra.mxu1 %v3437_v63 }
 0x28d   : > { %v2088_v58 = vadd.f32 %v2087_v43, %v2086_v8 }
 0x28f   : > { %v2089_v41 = vmul.f32 0.015625, %v2088_v58 }
 0x291   : > { %v2090_v59 = vpack.c.bf16 %v2089_v41, %v2089_v41 }
 0x293   : > { %3206 = vmatmul.mubr.bf16.vlgmr.msra.gmra.mrb[32].mxu0 %v2090_v59  ;;  %v2573_v59 = vlaneseq }
 0x294   : > { %3210 = vmatpush3.bf16.msra.mxu0 %v3390_v27  ;;  %3225 = vmatprep.mubr.msk.bf16.mxu0 %vm3453_vm3, %v3452_v19 }
 0x295   : > { %3211 = vmatprep.subr.bf16.mxu0 %v3452_v19  ;;  %vm2701_vm4 = vcmp.lt.s32.totalorder %v2573_v59, 384 }
 0x298   : > { %3212 = vmatpush3.bf16.msra.mxu0 %v3391_v0  ;;  %v2574_v0 = vshrl.u32 %v2573_v59, 7 }
 0x299   : > { %3213 = vmatprep.subr.bf16.mxu0 %v3452_v19 }
 0x29c   : > { %3214 = vmatpush3.bf16.msra.mxu0 %v3392_v54  ;;  %v2575_v54 = vsub.s32 0, %v2574_v0 }
 0x29d   : > { %3215 = vmatprep.subr.bf16.mxu0 %v3452_v19 }
 0x2a0   : > { %3216 = vmatpush3.bf16.msra.mxu0 %v3393_v60  ;;  %v2583_v60 = vsub.s32 2, %v2574_v0 }
 0x2a1   : > { %3217 = vmatprep.subr.bf16.mxu0 %v3452_v19 }
 0x2a4   : > { %3218 = vmatpush3.bf16.msra.mxu0 %v3394_v35  ;;  %v2443_v35 = vld [vmem:[%s4265_s12] sm:$0x7] }
 0x2a5   : > { %3219 = vmatprep.subr.bf16.mxu0 %v3452_v19 }
 0x2a8   : > { %3220 = vmatpush3.bf16.msra.mxu0 %v3395_v31  ;;  %v2579_v31 = vsub.s32 1, %v2574_v0 }
 0x2a9   : > { %3221 = vmatprep.subr.bf16.mxu0 %v3452_v19 }
 0x2ac   : > { %3222 = vmatpush3.bf16.msra.mxu0 %v3396_v36  ;;  %v2576_v36 = vrot.slane %v2443_v35, %v2575_v54 }
 0x2ad   : > { %3223 = vmatprep.subr.bf16.mxu0 %v3452_v19 }
 0x2b0   : > { %3224 = vmatpush3.bf16.msra.mxu0 %v3397_v39  ;;  %v2584_v39 = vrot.slane %v2443_v35, %v2583_v60 }
 0x2b1   : > { %3229 = vmatprep.subr.bf16.mxu0 %v3452_v19 }
 0x366   : > { %v2190_v5 = vpop.f32.mrb[32].mxu0 }
 0x367   : > { %v2191_v20 = vadd.f32 %v2190_v5, %v2107_v12  ;;  %v3207_v23 = vpop.f32.mrb[33].mxu0  ;;  %v2580_v12 = vrot.slane %v2443_v35, %v2579_v31 }
 0x368   : > { %v2193_v49 = vpop.f32.mrb[34].mxu0 }
 0x369   : > { %v2196_v55 = vpack.c.bf16 %v2191_v20, %v2191_v20  ;;  %v3208_v1 = vpop.f32.mrb[35].mxu0 }
 0x36b   : > { %3226 = vmatmul.mubr.bf16.vlgmr.msra.gmra.mrb[36].mxu0 %v2196_v55 }
 0x36c   : > { %3230 = vmatpush3.bf16.msra.mxu0 %v3398_v2  ;;  %3245 = vmatprep.mubr.msk.bf16.mxu0 %vm3453_vm3, %v3452_v19 }
 0x36d   : > { %3231 = vmatprep.subr.bf16.mxu0 %v3452_v19 }
 0x370   : > { %3232 = vmatpush3.bf16.msra.mxu0 %v3399_v7 }
 0x371   : > { %3233 = vmatprep.subr.bf16.mxu0 %v3452_v19 }
 0x374   : > { %3234 = vmatpush3.bf16.msra.mxu0 %v3400_v9 }
 0x375   : > { %3235 = vmatprep.subr.bf16.mxu0 %v3452_v19 }
 0x378   : > { %3236 = vmatpush3.bf16.msra.mxu0 %v3401_v16 }
 0x379   : > { %3237 = vmatprep.subr.bf16.mxu0 %v3452_v19 }
 0x37c   : > { %3238 = vmatpush3.bf16.msra.mxu0 %v3402_v15 }
 0x37d   : > { %3239 = vmatprep.subr.bf16.mxu0 %v3452_v19 }
 0x380   : > { %3240 = vmatpush3.bf16.msra.mxu0 %v3403_v45  ;;  %v3455_v45 = vmov 1966171168  }
 0x381   : > { %3241 = vmatprep.subr.bf16.mxu0 %v3452_v19 }
 0x384   : > { %3242 = vmatpush3.bf16.msra.mxu0 %v3404_v28  ;;  %v2677_v28 = vunpack.c.l.s4 %v3455_v45 }
 0x385   : > { %3243 = vmatprep.subr.bf16.mxu0 %v3452_v19 }
 0x388   : > { %3244 = vmatpush3.bf16.msra.mxu0 %v3405_v33  ;;  %v2678_v33 = vunpack.c.0.s8 %v2677_v28 }
 0x389   : > { %2588 = vmatprep.subr.bf16.mxu0 %v3408_v4 }
 0x38a   : > { %v2681_v37 = vsub.s32 %v2678_v33, %v2574_v0 }
 0x43e   : > { %v2296_v10 = vpop.f32.mrb[36].mxu0 }
 0x43f   : > { %v2297_v52 = vadd.f32 %v2296_v10, %v2213_v46  ;;  %v3227_v62 = vpop.f32.mrb[37].mxu0 }
 0x440   : > { %v2299_v53 = vpop.f32.mrb[38].mxu0 }
 0x441   : > { %v2302_v30 = vmax.f32 %v2297_v52, 0.0  ;;  %v3228_v40 = vpop.f32.mrb[39].mxu0 }
 0x443   : > { %v2303_v42 = vpack.c.bf16 %v2302_v30, %v2302_v30 }
 0x445   : > { %3246 = vmatmul.mubr.bf16.vlgmr.msra.gmra.mrb[40].mxu0 %v2303_v42 }
 0x446   : > { %2589 = vmatpush1.bf16.msra.mxu0 %v3406_v22  ;;  %2620 = vmatprep.mubr.bf16.mxu0 %v3454_v34 }
 0x447   : > { %2590 = vmatprep.subr.bf16.mxu0 %v3412_v18 }
 0x44a   : > { %2591 = vmatpush1.bf16.msra.mxu0 %v3410_v57 }
 0x44b   : > { %2592 = vmatprep.subr.bf16.mxu0 %v3416_v32 }
 0x44e   : > { %2593 = vmatpush1.bf16.msra.mxu0 %v3414_v11 }
 0x44f   : > { %2594 = vmatprep.subr.bf16.mxu0 %v3420_v14 }
 0x452   : > { %2595 = vmatpush1.bf16.msra.mxu0 %v3418_v3 }
 0x453   : > { %2596 = vmatprep.subr.bf16.mxu0 %v3424_v38 }
 0x456   : > { %2597 = vmatpush1.bf16.msra.mxu0 %v3422_v21 }
 0x457   : > { %2598 = vmatprep.subr.bf16.mxu0 %v3428_v6 }
 0x45a   : > { %2599 = vmatpush1.bf16.msra.mxu0 %v3426_v61 }
 0x45b   : > { %2600 = vmatprep.subr.bf16.mxu0 %v3432_v44 }
 0x45e   : > { %2601 = vmatpush1.bf16.msra.mxu0 %v3430_v24 }
 0x45f   : > { %2602 = vmatprep.subr.bf16.mxu0 %v3436_v26 }
 0x462   : > { %2603 = vmatpush1.bf16.msra.mxu0 %v3434_v48 }
 0x518   : > { %v2403_v56 = vpop.f32.mrb[40].mxu0 }
 0x519   : > { %v2404_v8 = vadd.f32 %v2403_v56, %v2320_v25  ;;  %v3247_v19 = vpop.f32.mrb[41].mxu0 }
 0x51a   : > { %v2406_v43 = vpop.f32.mrb[42].mxu0 }
 0x51b   : > { %v2409_v58 = vmax.f32 %v2404_v8, 0.0  ;;  %v3248_v41 = vpop.f32.mrb[43].mxu0 }
 0x51d   : > { %v2410_v27 = vpack.c.bf16 %v2409_v58, %v2409_v58 }
 0x51f   : > { %2621 = vmatmul.mubr.bf16.vlgmr.msra.gmra.mrb[44].mxu0 %v2410_v27  ;;  %3266 = vmatmul.mubr.bf16.vlgmr.msra.gmra.mrb[8].mxu1 %v2410_v27 }
 0x5f2   : > { %v2622_v5 = vpop.f32.mrb[44].mxu0  ;;  %v2663_v20 = vpop.f32.mrb[8].mxu1 }
 0x5f3   : > { %v2623_v23 = vadd.f32 %v2622_v5, %v2576_v36  ;;  %v2664_v49 = vadd.f32 %v2663_v20, %v2584_v39  ;;  %v2624_v2 = vpop.f32.mrb[45].mxu0  ;;  %v3267_v55 = vpop.f32.mrb[9].mxu1 }
 0x5f4   : > { %v2625_v1 = vadd.f32 %v2624_v2, %v2580_v12  ;;  %v2626_v7 = vpop.f32.mrb[46].mxu0  ;;  %v2666_v9 = vpop.f32.mrb[10].mxu1 }
 0x5f5   : > { %3438 = vtanh.f32 %v2623_v23  ;;  %v2627_v16 = vpop.f32.mrb[47].mxu0  ;;  %v3268_v15 = vpop.f32.mrb[11].mxu1 }
 0x5f6   : > { %3440 = vtanh.f32 %v2664_v49 }
 0x5f7   : > { %3442 = vtanh.f32 %v2625_v1 }
 0x5ff   : > { %v3439_v4 = vpop.eup %3438 }
 0x600   : > { %v3441_v29 = vpop.eup %3440 }
 0x601   : > { %v3443_v47 = vpop.eup %3442  ;;  %v2689_v17 = vrot.slane %v3441_v29, %v2681_v37 }
 0x602   : > { %v2675_v50 = vcombine.low %v3439_v4, %v3443_v47 }
 0x604   : > { %v2682_v51 = vrot.slane %v2675_v50, %v2681_v37 }
 0x606   : > { %v2690_v46 = vcombine.low %v2682_v51, %v2689_v17 }
 0x608   : > { %v2697_v10 = vrot.slane %v2690_v46, %v2681_v37 }
 0x60a   : > { %2703 = vst.msk [vmem:[%s438_s15] sm:$0x7] %vm2701_vm4, %v2697_v10 }
 0x60b PF: > { %s23_s25 = sadd.s32 1, %s3450_s25  }
 0x60c   : > { %p20_p4 = scmp.ge.s32.totalorder %s23_s25, 4  }
 0x60e   :  { %22 = sbr.rel (!%p20_p4) target bundleno = 1 (0x1), region = 110 }

</bundles_post_ra>
